<compile_context>
chip_gen: v6e
topology: v6e:2x2x1
jax: 0.10.0
libtpu: 0.0.40
codegen_flags: <defaults>
</compile_context>

<pallas_src>
import functools

import jax
import jax.numpy as jnp
from jax import lax
from jax.experimental import pallas as pl
from jax.experimental.pallas import tpu as pltpu

# ---- model hyper-params (consistent with the module's args) ----------------------
HIDDEN_DIM = 64                   # args.hidden_dim
N_LAYERS = 1                      # args.n_layers
EMB_DIM = HIDDEN_DIM // 3         # 21
COMB_IN = EMB_DIM * 4             # 84  (comb_proj in_features)
N_TEST = 10
N_QUESTIONS = 20
N_TAG = 12

GATE_LANES = 128                  # lane group per gate (r @ 0, z @ 128, n @ 256)
PACK_W = 3 * GATE_LANES           # 384
OUT_LANES = 128                   # lane-dense output slab width

_vmem = functools.partial(pl.BlockSpec, memory_space=pltpu.MemorySpace.VMEM)


# ================================ fused Pallas kernel ==============================

def _gru_fused_kernel(idx_ref, embw_ref, whp_ref, fcw_ref, bias_ref,
                      o_ref, gx_s, h_s, *, seq_len, bpad, hidden):
    """Fused embedding-gather -> (pre-folded comb_proj + input gate proj) -> GRU ->
    fc -> sigmoid.

    idx_ref : (S*Bpad, 4) int32  time-major rows (row = t*Bpad + b); per-feature
                                 indices with table offsets pre-added
    embw_ref: (K, 384)           stacked effective gate-embedding tables
                                 (comb_proj + W_i{r,z,n} + all input-side biases folded)
    whp_ref : (64, 384)          hidden gate weights, gate groups at lanes 0/128/256
    fcw_ref : (64, 128)          fc weight in column 0, rest zero
    bias_ref: (8, 128)           row 0 lanes 0:64 = b_hn ; row 1 = fc bias (broadcast)
    o_ref   : (S*Bpad, 128)      sigmoid(fc(h_t)) in column 0 (lane-dense slab)
    gx_s    : (S*Bpad, 384)      VMEM scratch: input-side gate pre-activations
    h_s     : (S*Bpad, 64)       VMEM scratch: hidden-state sequence
    """
    sb = seq_len * bpad
    k_rows = embw_ref.shape[0]

    # ---- embedding gather as a one-hot matmul (whole sequence, one MXU op) -------
    iota = lax.broadcasted_iota(jnp.int32, (sb, k_rows), 1)
    oh = None
    for f in range(4):                                  # 4 features per token
        eq = idx_ref[:, f:f + 1] == iota                # (SB,1) bcast vs (SB,K)
        oh = eq if oh is None else (oh | eq)
    oh = oh.astype(jnp.float32)                         # (SB, K) one-hot (4 ones/row)
    # gx = embeddings -> comb_proj -> input gate projections (+ biases), pre-folded
    gx_s[...] = jnp.dot(oh, embw_ref[...], preferred_element_type=jnp.float32)

    bhn = bias_ref[0:1, 0:hidden]                       # (1, 64) b_hn (n-gate only)

    # ---- GRU recurrence: one fused hidden-side matmul per step, fully unrolled ---
    h = jnp.zeros((bpad, hidden), jnp.float32)
    for t in range(seq_len):                            # S is small & static
        gx = gx_s[pl.ds(t * bpad, bpad), :]             # (Bpad, 384), 8-aligned rows
        if t == 0:
            # h0 == 0: hidden-side contributions vanish; skip the matmul.
            r = jax.nn.sigmoid(gx[:, 0:hidden])
            z = jax.nn.sigmoid(gx[:, GATE_LANES:GATE_LANES + hidden])
            n = jnp.tanh(gx[:, 2 * GATE_LANES:2 * GATE_LANES + hidden] + r * bhn)
            h = (1.0 - z) * n
        else:
            gh = jnp.dot(h, whp_ref[...], preferred_element_type=jnp.float32)
            r = jax.nn.sigmoid(gx[:, 0:hidden] + gh[:, 0:hidden])
            z = jax.nn.sigmoid(gx[:, GATE_LANES:GATE_LANES + hidden]
                               + gh[:, GATE_LANES:GATE_LANES + hidden])
            n = jnp.tanh(gx[:, 2 * GATE_LANES:2 * GATE_LANES + hidden]
                         + r * (gh[:, 2 * GATE_LANES:2 * GATE_LANES + hidden] + bhn))
            h = (1.0 - z) * n + z * h
        h_s[pl.ds(t * bpad, bpad), :] = h               # 8-aligned store

    # ---- fc + sigmoid tail on the resident hidden sequence (lane-dense output) ---
    logits = (jnp.dot(h_s[...], fcw_ref[...], preferred_element_type=jnp.float32)
              + bias_ref[1:2, :])                       # (SB, 128), col 0 valid
    o_ref[...] = jax.nn.sigmoid(logits)


# ============================ parameters & packing =================================

def init_params(key):
    """Raw, PyTorch-layout parameters (used by the pure-JAX reference)."""
    H, E = HIDDEN_DIM, EMB_DIM
    ks = jax.random.split(key, 24)

    def nrm(k, shape, scale):
        return (scale * jax.random.normal(k, shape)).astype(jnp.float32)

    p = {}
    # embedding tables (nn.Embedding default ~ N(0,1))
    p['emb_interaction'] = nrm(ks[0], (3, E), 1.0)
    p['emb_test'] = nrm(ks[1], (N_TEST + 1, E), 1.0)
    p['emb_question'] = nrm(ks[2], (N_QUESTIONS + 1, E), 1.0)
    p['emb_tag'] = nrm(ks[3], (N_TAG + 1, E), 1.0)
    # comb_proj (stored transposed: (in, out))
    p['comb_w'] = nrm(ks[4], (COMB_IN, H), 0.1)
    p['comb_b'] = nrm(ks[5], (1, H), 0.05)
    # GRU layer 0, per-gate (r, z, n), transposed: (H_in, H_out)
    p['w_ir'] = nrm(ks[6], (H, H), 0.1)
    p['w_iz'] = nrm(ks[7], (H, H), 0.1)
    p['w_in'] = nrm(ks[8], (H, H), 0.1)
    p['w_hr'] = nrm(ks[9], (H, H), 0.1)
    p['w_hz'] = nrm(ks[10], (H, H), 0.1)
    p['w_hn'] = nrm(ks[11], (H, H), 0.1)
    p['b_ir'] = nrm(ks[12], (1, H), 0.05)
    p['b_iz'] = nrm(ks[13], (1, H), 0.05)
    p['b_in'] = nrm(ks[14], (1, H), 0.05)
    p['b_hr'] = nrm(ks[15], (1, H), 0.05)
    p['b_hz'] = nrm(ks[16], (1, H), 0.05)
    p['b_hn'] = nrm(ks[17], (1, H), 0.05)
    # fc
    p['fc_w'] = nrm(ks[18], (H, 1), 0.1)
    p['fc_b'] = nrm(ks[19], (1, 1), 0.05)
    return p


def pack_gru_params(p):
    """One-time fold of embeddings + comb_proj + input-side gate weights/biases into
    packed kernel operands (done once at init, not per call)."""
    H, E = HIDDEN_DIM, EMB_DIM
    Wc, bc = p['comb_w'], p['comb_b']                          # (84,H), (1,H)
    gate_w = [p['w_ir'], p['w_iz'], p['w_in']]
    gate_b = [p['b_ir'] + p['b_hr'], p['b_iz'] + p['b_hz'], p['b_in']]

    tables = [p['emb_interaction'], p['emb_test'], p['emb_question'], p['emb_tag']]
    vocab = [t.shape[0] for t in tables]
    vpad = [((v + 7) // 8) * 8 for v in vocab]                 # sublane-pad each table
    offsets, off = [], 0
    for v in vpad:
        offsets.append(off)
        off += v
    k_rows = off                                               # total stacked rows

    # stacked effective gate-embedding table: row block f = table_f, lane group g = gate g
    emb_eff = jnp.zeros((k_rows, PACK_W), jnp.float32)
    for f, tab in enumerate(tables):
        blk = Wc[f * E:(f + 1) * E]                            # (E, H) comb block
        for g in range(3):
            eff = tab @ blk @ gate_w[g]                        # (vocab_f, H)
            if f == 0:                                         # fold ALL gx biases once
                eff = eff + (bc @ gate_w[g] + gate_b[g])       # (interaction appears
            emb_eff = emb_eff.at[offsets[f]:offsets[f] + vocab[f],   # exactly once/row)
                                 g * GATE_LANES:g * GATE_LANES + H].set(eff)

    # packed hidden-side gate weights
    w_h_pack = jnp.zeros((H, PACK_W), jnp.float32)
    for g, w in enumerate([p['w_hr'], p['w_hz'], p['w_hn']]):
        w_h_pack = w_h_pack.at[:, g * GATE_LANES:g * GATE_LANES + H].set(w)

    # padded fc weight (col 0 valid) + bias slab (b_hn row 0, fc_b row 1)
    fc_w_pad = jnp.zeros((H, OUT_LANES), jnp.float32).at[:, 0:1].set(p['fc_w'])
    bias = jnp.zeros((8, OUT_LANES), jnp.float32)
    bias = bias.at[0, 0:H].set(p['b_hn'][0])
    bias = bias.at[1, :].set(p['fc_b'][0, 0])

    return {'emb_eff': emb_eff, 'w_h_pack': w_h_pack, 'fc_w_pad': fc_w_pad,
            'bias': bias, 'offsets': tuple(offsets)}


# ================================== forward ========================================

def gru_forward(packed, inputs):
    test, question, tag, _unused, mask, interaction = inputs   # mask unused (as in module)
    B, S = interaction.shape
    bpad = ((B + 7) // 8) * 8                                  # sublane-pad batch
    off = packed['offsets']

    # tiny int32 index-packing glue: time-major rows, table offsets pre-added
    idx = jnp.stack([interaction.astype(jnp.int32) + off[0],
                     test.astype(jnp.int32) + off[1],
                     question.astype(jnp.int32) + off[2],
                     tag.astype(jnp.int32) + off[3]], axis=-1)  # (B, S, 4)
    idx = jnp.swapaxes(idx, 0, 1)                               # (S, B, 4)
    idx = jnp.pad(idx, ((0, 0), (0, bpad - B), (0, 0))).reshape(S * bpad, 4)

    kernel = functools.partial(_gru_fused_kernel, seq_len=S, bpad=bpad,
                               hidden=HIDDEN_DIM)
    out = pl.pallas_call(
        kernel,
        out_shape=jax.ShapeDtypeStruct((S * bpad, OUT_LANES), jnp.float32),
        in_specs=[_vmem()] * 5,
        out_specs=_vmem(),
        scratch_shapes=[pltpu.VMEM((S * bpad, PACK_W), jnp.float32),      # gx
                        pltpu.VMEM((S * bpad, HIDDEN_DIM), jnp.float32)], # h sequence
    )(idx, packed['emb_eff'], packed['w_h_pack'], packed['fc_w_pad'], packed['bias'])

    # column 0 holds the logits; drop batch padding and return (B, S)
    return out[:, 0].reshape(S, bpad)[:, :B].T


# ---------------------- pure-JAX reference (sanity check only) ---------------------

def _embed_concat(p, test, question, tag, interaction):
    return jnp.concatenate(
        [jnp.take(p['emb_interaction'], interaction, axis=0),
         jnp.take(p['emb_test'], test, axis=0),
         jnp.take(p['emb_question'], question, axis=0),
         jnp.take(p['emb_tag'], tag, axis=0)], axis=2)          # (B, S, 4E)


def gru_forward_ref(p, inputs):
    test, question, tag, _unused, mask, interaction = inputs
    B, S = interaction.shape
    embed = _embed_concat(p, test, question, tag, interaction)
    x = jnp.einsum('bsc,ch->bsh', embed, p['comb_w']) + p['comb_b']
    b_r = p['b_ir'] + p['b_hr']
    b_z = p['b_iz'] + p['b_hz']

    def step(h, x_t):
        r = jax.nn.sigmoid(x_t @ p['w_ir'] + b_r + h @ p['w_hr'])
        z = jax.nn.sigmoid(x_t @ p['w_iz'] + b_z + h @ p['w_hz'])
        n = jnp.tanh(x_t @ p['w_in'] + p['b_in'] + r * (h @ p['w_hn'] + p['b_hn']))
        h = (1.0 - z) * n + z * h
        return h, h

    h0 = jnp.zeros((B, HIDDEN_DIM), jnp.float32)
    _, hs = lax.scan(step, h0, jnp.transpose(x, (1, 0, 2)))     # (S, B, H)
    out = jnp.transpose(hs, (1, 0, 2))                          # (B, S, H)
    logits = out @ p['fc_w'] + p['fc_b']
    return jax.nn.sigmoid(logits)[..., 0]                       # (B, S)


# ===================================== main =========================================

if __name__ == "__main__":
    B, S = 2, 8
    key = jax.random.PRNGKey(0)
    kp, k1, k2, k3, k4 = jax.random.split(key, 5)

    params = init_params(kp)
    packed = pack_gru_params(params)

    test = jax.random.randint(k1, (B, S), 0, N_TEST + 1)
    question = jax.random.randint(k2, (B, S), 0, N_QUESTIONS + 1)
    tag = jax.random.randint(k3, (B, S), 0, N_TAG + 1)
    interaction = jax.random.randint(k4, (B, S), 0, 3)
    unused = jnp.zeros((B, S), jnp.float32)
    mask = (jnp.arange(S)[None, :] >= 2).astype(jnp.float32) * jnp.ones((B, 1), jnp.float32)

    inputs = (test, question, tag, unused, mask, interaction)

    preds = gru_forward(packed, inputs)
    jax.block_until_ready(preds)
    assert preds.shape == (B, S)

    ref = gru_forward_ref(params, inputs)
    err = float(jnp.max(jnp.abs(preds - ref)))
    assert err < 5e-3, f"max abs diff vs reference: {err}"

    print("KERNEL_OK")
</pallas_src>

<mosaic_0001>
module attributes {stable_mosaic.version = 11 : i64} {
  func.func @_gru_fused_kernel(%arg0: memref<64x4xi32, #tpu.memory_space<vmem>>, %arg1: memref<64x384xf32, #tpu.memory_space<vmem>>, %arg2: memref<64x384xf32, #tpu.memory_space<vmem>>, %arg3: memref<64x128xf32, #tpu.memory_space<vmem>>, %arg4: memref<8x128xf32, #tpu.memory_space<vmem>>, %arg5: memref<64x128xf32, #tpu.memory_space<vmem>>, %arg6: memref<64x384xf32, #tpu.memory_space<vmem>>, %arg7: memref<64x64xf32, #tpu.memory_space<vmem>>) attributes {dimension_semantics = [], scalar_prefetch = 0 : i64, scratch_operands = 2 : i64, tpu.core_type = #tpu.core_type<tc>} {
    %0 = tpu.iota {dimensions = array<i32: 1>} : vector<64x64xi32>
    %c0 = arith.constant 0 : index
    %c0_0 = arith.constant 0 : index
    %1 = vector.load %arg0[%c0, %c0_0] : memref<64x4xi32, #tpu.memory_space<vmem>>, vector<64x1xi32>
    %2 = vector.broadcast %1 : vector<64x1xi32> to vector<64x64xi32>
    %3 = arith.cmpi eq, %2, %0 : vector<64x64xi32>
    %c0_1 = arith.constant 0 : index
    %c1 = arith.constant 1 : index
    %4 = vector.load %arg0[%c0_1, %c1] : memref<64x4xi32, #tpu.memory_space<vmem>>, vector<64x1xi32>
    %5 = vector.broadcast %4 : vector<64x1xi32> to vector<64x64xi32>
    %6 = arith.cmpi eq, %5, %0 : vector<64x64xi32>
    %7 = arith.ori %3, %6 : vector<64x64xi1>
    %c0_2 = arith.constant 0 : index
    %c2 = arith.constant 2 : index
    %8 = vector.load %arg0[%c0_2, %c2] : memref<64x4xi32, #tpu.memory_space<vmem>>, vector<64x1xi32>
    %9 = vector.broadcast %8 : vector<64x1xi32> to vector<64x64xi32>
    %10 = arith.cmpi eq, %9, %0 : vector<64x64xi32>
    %11 = arith.ori %7, %10 : vector<64x64xi1>
    %c0_3 = arith.constant 0 : index
    %c3 = arith.constant 3 : index
    %12 = vector.load %arg0[%c0_3, %c3] : memref<64x4xi32, #tpu.memory_space<vmem>>, vector<64x1xi32>
    %13 = vector.broadcast %12 : vector<64x1xi32> to vector<64x64xi32>
    %14 = arith.cmpi eq, %13, %0 : vector<64x64xi32>
    %15 = arith.ori %11, %14 : vector<64x64xi1>
    %16 = arith.extui %15 : vector<64x64xi1> to vector<64x64xi32>
    %17 = arith.sitofp %16 : vector<64x64xi32> to vector<64x64xf32>
    %c0_4 = arith.constant 0 : index
    %c0_5 = arith.constant 0 : index
    %18 = vector.load %arg1[%c0_4, %c0_5] : memref<64x384xf32, #tpu.memory_space<vmem>>, vector<64x384xf32>
    %cst = arith.constant dense<0.000000e+00> : vector<64x384xf32>
    %19 = tpu.matmul %17, %18, %cst {dimension_numbers = #tpu.dot_dimension_numbers<[1], [0], [0], [1], [0, 0, 1, 1], [], []>} : vector<64x64xf32>, vector<64x384xf32>, vector<64x384xf32> -> vector<64x384xf32>
    %c0_6 = arith.constant 0 : index
    %c0_7 = arith.constant 0 : index
    %20 = vector.load %arg6[%c0_6, %c0_7] : memref<64x384xf32, #tpu.memory_space<vmem>>, vector<64x384xf32>
    tpu.vector_store %arg6[%c0_6, %c0_7], %19 {strides = array<i32>} : memref<64x384xf32, #tpu.memory_space<vmem>>, vector<64x384xf32>,
    %c0_8 = arith.constant 0 : index
    %c0_9 = arith.constant 0 : index
    %21 = vector.load %arg4[%c0_8, %c0_9] : memref<8x128xf32, #tpu.memory_space<vmem>>, vector<1x64xf32>
    %c0_10 = arith.constant 0 : index
    %c0_11 = arith.constant 0 : index
    %22 = vector.load %arg6[%c0_10, %c0_11] : memref<64x384xf32, #tpu.memory_space<vmem>>, vector<8x384xf32>
    %23 = vector.extract_strided_slice %22 {offsets = [0, 0], sizes = [8, 64], strides = [1, 1]} : vector<8x384xf32> to vector<8x64xf32>
    %24 = arith.negf %23 : vector<8x64xf32>
    %25 = math.exp %24 : vector<8x64xf32>
    %cst_12 = arith.constant 1.000000e+00 : f32
    %26 = vector.broadcast %cst_12 : f32 to vector<8x64xf32>
    %27 = arith.addf %26, %25 : vector<8x64xf32>
    %28 = arith.divf %26, %27 : vector<8x64xf32>
    %29 = vector.extract_strided_slice %22 {offsets = [0, 128], sizes = [8, 64], strides = [1, 1]} : vector<8x384xf32> to vector<8x64xf32>
    %30 = arith.negf %29 : vector<8x64xf32>
    %31 = math.exp %30 : vector<8x64xf32>
    %cst_13 = arith.constant 1.000000e+00 : f32
    %32 = vector.broadcast %cst_13 : f32 to vector<8x64xf32>
    %33 = arith.addf %32, %31 : vector<8x64xf32>
    %34 = arith.divf %32, %33 : vector<8x64xf32>
    %35 = vector.extract_strided_slice %22 {offsets = [0, 256], sizes = [8, 64], strides = [1, 1]} : vector<8x384xf32> to vector<8x64xf32>
    %36 = vector.broadcast %21 : vector<1x64xf32> to vector<8x64xf32>
    %37 = arith.mulf %28, %36 : vector<8x64xf32>
    %38 = arith.addf %35, %37 : vector<8x64xf32>
    %39 = math.tanh %38 : vector<8x64xf32>
    %cst_14 = arith.constant 1.000000e+00 : f32
    %40 = vector.broadcast %cst_14 : f32 to vector<8x64xf32>
    %41 = arith.subf %40, %34 : vector<8x64xf32>
    %42 = arith.mulf %41, %39 : vector<8x64xf32>
    %c0_15 = arith.constant 0 : index
    %c0_16 = arith.constant 0 : index
    %43 = vector.load %arg7[%c0_15, %c0_16] : memref<64x64xf32, #tpu.memory_space<vmem>>, vector<8x64xf32>
    tpu.vector_store %arg7[%c0_15, %c0_16], %42 {strides = array<i32>} : memref<64x64xf32, #tpu.memory_space<vmem>>, vector<8x64xf32>,
    %c8 = arith.constant 8 : index
    %c0_17 = arith.constant 0 : index
    %44 = vector.load %arg6[%c8, %c0_17] : memref<64x384xf32, #tpu.memory_space<vmem>>, vector<8x384xf32>
    %c0_18 = arith.constant 0 : index
    %c0_19 = arith.constant 0 : index
    %45 = vector.load %arg2[%c0_18, %c0_19] : memref<64x384xf32, #tpu.memory_space<vmem>>, vector<64x384xf32>
    %cst_20 = arith.constant dense<0.000000e+00> : vector<8x384xf32>
    %46 = tpu.matmul %42, %45, %cst_20 {dimension_numbers = #tpu.dot_dimension_numbers<[1], [0], [0], [1], [0, 0, 1, 1], [], []>} : vector<8x64xf32>, vector<64x384xf32>, vector<8x384xf32> -> vector<8x384xf32>
    %47 = vector.extract_strided_slice %44 {offsets = [0, 0], sizes = [8, 64], strides = [1, 1]} : vector<8x384xf32> to vector<8x64xf32>
    %48 = vector.extract_strided_slice %46 {offsets = [0, 0], sizes = [8, 64], strides = [1, 1]} : vector<8x384xf32> to vector<8x64xf32>
    %49 = arith.addf %47, %48 : vector<8x64xf32>
    %50 = arith.negf %49 : vector<8x64xf32>
    %51 = math.exp %50 : vector<8x64xf32>
    %cst_21 = arith.constant 1.000000e+00 : f32
    %52 = vector.broadcast %cst_21 : f32 to vector<8x64xf32>
    %53 = arith.addf %52, %51 : vector<8x64xf32>
    %54 = arith.divf %52, %53 : vector<8x64xf32>
    %55 = vector.extract_strided_slice %44 {offsets = [0, 128], sizes = [8, 64], strides = [1, 1]} : vector<8x384xf32> to vector<8x64xf32>
    %56 = vector.extract_strided_slice %46 {offsets = [0, 128], sizes = [8, 64], strides = [1, 1]} : vector<8x384xf32> to vector<8x64xf32>
    %57 = arith.addf %55, %56 : vector<8x64xf32>
    %58 = arith.negf %57 : vector<8x64xf32>
    %59 = math.exp %58 : vector<8x64xf32>
    %cst_22 = arith.constant 1.000000e+00 : f32
    %60 = vector.broadcast %cst_22 : f32 to vector<8x64xf32>
    %61 = arith.addf %60, %59 : vector<8x64xf32>
    %62 = arith.divf %60, %61 : vector<8x64xf32>
    %63 = vector.extract_strided_slice %44 {offsets = [0, 256], sizes = [8, 64], strides = [1, 1]} : vector<8x384xf32> to vector<8x64xf32>
    %64 = vector.extract_strided_slice %46 {offsets = [0, 256], sizes = [8, 64], strides = [1, 1]} : vector<8x384xf32> to vector<8x64xf32>
    %65 = vector.broadcast %21 : vector<1x64xf32> to vector<8x64xf32>
    %66 = arith.addf %64, %65 : vector<8x64xf32>
    %67 = arith.mulf %54, %66 : vector<8x64xf32>
    %68 = arith.addf %63, %67 : vector<8x64xf32>
    %69 = math.tanh %68 : vector<8x64xf32>
    %cst_23 = arith.constant 1.000000e+00 : f32
    %70 = vector.broadcast %cst_23 : f32 to vector<8x64xf32>
    %71 = arith.subf %70, %62 : vector<8x64xf32>
    %72 = arith.mulf %71, %69 : vector<8x64xf32>
    %73 = arith.mulf %62, %42 : vector<8x64xf32>
    %74 = arith.addf %72, %73 : vector<8x64xf32>
    %c8_24 = arith.constant 8 : index
    %c0_25 = arith.constant 0 : index
    %75 = vector.load %arg7[%c8_24, %c0_25] : memref<64x64xf32, #tpu.memory_space<vmem>>, vector<8x64xf32>
    tpu.vector_store %arg7[%c8_24, %c0_25], %74 {strides = array<i32>} : memref<64x64xf32, #tpu.memory_space<vmem>>, vector<8x64xf32>,
    %c16 = arith.constant 16 : index
    %c0_26 = arith.constant 0 : index
    %76 = vector.load %arg6[%c16, %c0_26] : memref<64x384xf32, #tpu.memory_space<vmem>>, vector<8x384xf32>
    %c0_27 = arith.constant 0 : index
    %c0_28 = arith.constant 0 : index
    %77 = vector.load %arg2[%c0_27, %c0_28] : memref<64x384xf32, #tpu.memory_space<vmem>>, vector<64x384xf32>
    %cst_29 = arith.constant dense<0.000000e+00> : vector<8x384xf32>
    %78 = tpu.matmul %74, %77, %cst_29 {dimension_numbers = #tpu.dot_dimension_numbers<[1], [0], [0], [1], [0, 0, 1, 1], [], []>} : vector<8x64xf32>, vector<64x384xf32>, vector<8x384xf32> -> vector<8x384xf32>
    %79 = vector.extract_strided_slice %76 {offsets = [0, 0], sizes = [8, 64], strides = [1, 1]} : vector<8x384xf32> to vector<8x64xf32>
    %80 = vector.extract_strided_slice %78 {offsets = [0, 0], sizes = [8, 64], strides = [1, 1]} : vector<8x384xf32> to vector<8x64xf32>
    %81 = arith.addf %79, %80 : vector<8x64xf32>
    %82 = arith.negf %81 : vector<8x64xf32>
    %83 = math.exp %82 : vector<8x64xf32>
    %cst_30 = arith.constant 1.000000e+00 : f32
    %84 = vector.broadcast %cst_30 : f32 to vector<8x64xf32>
    %85 = arith.addf %84, %83 : vector<8x64xf32>
    %86 = arith.divf %84, %85 : vector<8x64xf32>
    %87 = vector.extract_strided_slice %76 {offsets = [0, 128], sizes = [8, 64], strides = [1, 1]} : vector<8x384xf32> to vector<8x64xf32>
    %88 = vector.extract_strided_slice %78 {offsets = [0, 128], sizes = [8, 64], strides = [1, 1]} : vector<8x384xf32> to vector<8x64xf32>
    %89 = arith.addf %87, %88 : vector<8x64xf32>
    %90 = arith.negf %89 : vector<8x64xf32>
    %91 = math.exp %90 : vector<8x64xf32>
    %cst_31 = arith.constant 1.000000e+00 : f32
    %92 = vector.broadcast %cst_31 : f32 to vector<8x64xf32>
    %93 = arith.addf %92, %91 : vector<8x64xf32>
    %94 = arith.divf %92, %93 : vector<8x64xf32>
    %95 = vector.extract_strided_slice %76 {offsets = [0, 256], sizes = [8, 64], strides = [1, 1]} : vector<8x384xf32> to vector<8x64xf32>
    %96 = vector.extract_strided_slice %78 {offsets = [0, 256], sizes = [8, 64], strides = [1, 1]} : vector<8x384xf32> to vector<8x64xf32>
    %97 = vector.broadcast %21 : vector<1x64xf32> to vector<8x64xf32>
    %98 = arith.addf %96, %97 : vector<8x64xf32>
    %99 = arith.mulf %86, %98 : vector<8x64xf32>
    %100 = arith.addf %95, %99 : vector<8x64xf32>
    %101 = math.tanh %100 : vector<8x64xf32>
    %cst_32 = arith.constant 1.000000e+00 : f32
    %102 = vector.broadcast %cst_32 : f32 to vector<8x64xf32>
    %103 = arith.subf %102, %94 : vector<8x64xf32>
    %104 = arith.mulf %103, %101 : vector<8x64xf32>
    %105 = arith.mulf %94, %74 : vector<8x64xf32>
    %106 = arith.addf %104, %105 : vector<8x64xf32>
    %c16_33 = arith.constant 16 : index
    %c0_34 = arith.constant 0 : index
    %107 = vector.load %arg7[%c16_33, %c0_34] : memref<64x64xf32, #tpu.memory_space<vmem>>, vector<8x64xf32>
    tpu.vector_store %arg7[%c16_33, %c0_34], %106 {strides = array<i32>} : memref<64x64xf32, #tpu.memory_space<vmem>>, vector<8x64xf32>,
    %c24 = arith.constant 24 : index
    %c0_35 = arith.constant 0 : index
    %108 = vector.load %arg6[%c24, %c0_35] : memref<64x384xf32, #tpu.memory_space<vmem>>, vector<8x384xf32>
    %c0_36 = arith.constant 0 : index
    %c0_37 = arith.constant 0 : index
    %109 = vector.load %arg2[%c0_36, %c0_37] : memref<64x384xf32, #tpu.memory_space<vmem>>, vector<64x384xf32>
    %cst_38 = arith.constant dense<0.000000e+00> : vector<8x384xf32>
    %110 = tpu.matmul %106, %109, %cst_38 {dimension_numbers = #tpu.dot_dimension_numbers<[1], [0], [0], [1], [0, 0, 1, 1], [], []>} : vector<8x64xf32>, vector<64x384xf32>, vector<8x384xf32> -> vector<8x384xf32>
    %111 = vector.extract_strided_slice %108 {offsets = [0, 0], sizes = [8, 64], strides = [1, 1]} : vector<8x384xf32> to vector<8x64xf32>
    %112 = vector.extract_strided_slice %110 {offsets = [0, 0], sizes = [8, 64], strides = [1, 1]} : vector<8x384xf32> to vector<8x64xf32>
    %113 = arith.addf %111, %112 : vector<8x64xf32>
    %114 = arith.negf %113 : vector<8x64xf32>
    %115 = math.exp %114 : vector<8x64xf32>
    %cst_39 = arith.constant 1.000000e+00 : f32
    %116 = vector.broadcast %cst_39 : f32 to vector<8x64xf32>
    %117 = arith.addf %116, %115 : vector<8x64xf32>
    %118 = arith.divf %116, %117 : vector<8x64xf32>
    %119 = vector.extract_strided_slice %108 {offsets = [0, 128], sizes = [8, 64], strides = [1, 1]} : vector<8x384xf32> to vector<8x64xf32>
    %120 = vector.extract_strided_slice %110 {offsets = [0, 128], sizes = [8, 64], strides = [1, 1]} : vector<8x384xf32> to vector<8x64xf32>
    %121 = arith.addf %119, %120 : vector<8x64xf32>
    %122 = arith.negf %121 : vector<8x64xf32>
    %123 = math.exp %122 : vector<8x64xf32>
    %cst_40 = arith.constant 1.000000e+00 : f32
    %124 = vector.broadcast %cst_40 : f32 to vector<8x64xf32>
    %125 = arith.addf %124, %123 : vector<8x64xf32>
    %126 = arith.divf %124, %125 : vector<8x64xf32>
    %127 = vector.extract_strided_slice %108 {offsets = [0, 256], sizes = [8, 64], strides = [1, 1]} : vector<8x384xf32> to vector<8x64xf32>
    %128 = vector.extract_strided_slice %110 {offsets = [0, 256], sizes = [8, 64], strides = [1, 1]} : vector<8x384xf32> to vector<8x64xf32>
    %129 = vector.broadcast %21 : vector<1x64xf32> to vector<8x64xf32>
    %130 = arith.addf %128, %129 : vector<8x64xf32>
    %131 = arith.mulf %118, %130 : vector<8x64xf32>
    %132 = arith.addf %127, %131 : vector<8x64xf32>
    %133 = math.tanh %132 : vector<8x64xf32>
    %cst_41 = arith.constant 1.000000e+00 : f32
    %134 = vector.broadcast %cst_41 : f32 to vector<8x64xf32>
    %135 = arith.subf %134, %126 : vector<8x64xf32>
    %136 = arith.mulf %135, %133 : vector<8x64xf32>
    %137 = arith.mulf %126, %106 : vector<8x64xf32>
    %138 = arith.addf %136, %137 : vector<8x64xf32>
    %c24_42 = arith.constant 24 : index
    %c0_43 = arith.constant 0 : index
    %139 = vector.load %arg7[%c24_42, %c0_43] : memref<64x64xf32, #tpu.memory_space<vmem>>, vector<8x64xf32>
    tpu.vector_store %arg7[%c24_42, %c0_43], %138 {strides = array<i32>} : memref<64x64xf32, #tpu.memory_space<vmem>>, vector<8x64xf32>,
    %c32 = arith.constant 32 : index
    %c0_44 = arith.constant 0 : index
    %140 = vector.load %arg6[%c32, %c0_44] : memref<64x384xf32, #tpu.memory_space<vmem>>, vector<8x384xf32>
    %c0_45 = arith.constant 0 : index
    %c0_46 = arith.constant 0 : index
    %141 = vector.load %arg2[%c0_45, %c0_46] : memref<64x384xf32, #tpu.memory_space<vmem>>, vector<64x384xf32>
    %cst_47 = arith.constant dense<0.000000e+00> : vector<8x384xf32>
    %142 = tpu.matmul %138, %141, %cst_47 {dimension_numbers = #tpu.dot_dimension_numbers<[1], [0], [0], [1], [0, 0, 1, 1], [], []>} : vector<8x64xf32>, vector<64x384xf32>, vector<8x384xf32> -> vector<8x384xf32>
    %143 = vector.extract_strided_slice %140 {offsets = [0, 0], sizes = [8, 64], strides = [1, 1]} : vector<8x384xf32> to vector<8x64xf32>
    %144 = vector.extract_strided_slice %142 {offsets = [0, 0], sizes = [8, 64], strides = [1, 1]} : vector<8x384xf32> to vector<8x64xf32>
    %145 = arith.addf %143, %144 : vector<8x64xf32>
    %146 = arith.negf %145 : vector<8x64xf32>
    %147 = math.exp %146 : vector<8x64xf32>
    %cst_48 = arith.constant 1.000000e+00 : f32
    %148 = vector.broadcast %cst_48 : f32 to vector<8x64xf32>
    %149 = arith.addf %148, %147 : vector<8x64xf32>
    %150 = arith.divf %148, %149 : vector<8x64xf32>
    %151 = vector.extract_strided_slice %140 {offsets = [0, 128], sizes = [8, 64], strides = [1, 1]} : vector<8x384xf32> to vector<8x64xf32>
    %152 = vector.extract_strided_slice %142 {offsets = [0, 128], sizes = [8, 64], strides = [1, 1]} : vector<8x384xf32> to vector<8x64xf32>
    %153 = arith.addf %151, %152 : vector<8x64xf32>
    %154 = arith.negf %153 : vector<8x64xf32>
    %155 = math.exp %154 : vector<8x64xf32>
    %cst_49 = arith.constant 1.000000e+00 : f32
    %156 = vector.broadcast %cst_49 : f32 to vector<8x64xf32>
    %157 = arith.addf %156, %155 : vector<8x64xf32>
    %158 = arith.divf %156, %157 : vector<8x64xf32>
    %159 = vector.extract_strided_slice %140 {offsets = [0, 256], sizes = [8, 64], strides = [1, 1]} : vector<8x384xf32> to vector<8x64xf32>
    %160 = vector.extract_strided_slice %142 {offsets = [0, 256], sizes = [8, 64], strides = [1, 1]} : vector<8x384xf32> to vector<8x64xf32>
    %161 = vector.broadcast %21 : vector<1x64xf32> to vector<8x64xf32>
    %162 = arith.addf %160, %161 : vector<8x64xf32>
    %163 = arith.mulf %150, %162 : vector<8x64xf32>
    %164 = arith.addf %159, %163 : vector<8x64xf32>
    %165 = math.tanh %164 : vector<8x64xf32>
    %cst_50 = arith.constant 1.000000e+00 : f32
    %166 = vector.broadcast %cst_50 : f32 to vector<8x64xf32>
    %167 = arith.subf %166, %158 : vector<8x64xf32>
    %168 = arith.mulf %167, %165 : vector<8x64xf32>
    %169 = arith.mulf %158, %138 : vector<8x64xf32>
    %170 = arith.addf %168, %169 : vector<8x64xf32>
    %c32_51 = arith.constant 32 : index
    %c0_52 = arith.constant 0 : index
    %171 = vector.load %arg7[%c32_51, %c0_52] : memref<64x64xf32, #tpu.memory_space<vmem>>, vector<8x64xf32>
    tpu.vector_store %arg7[%c32_51, %c0_52], %170 {strides = array<i32>} : memref<64x64xf32, #tpu.memory_space<vmem>>, vector<8x64xf32>,
    %c40 = arith.constant 40 : index
    %c0_53 = arith.constant 0 : index
    %172 = vector.load %arg6[%c40, %c0_53] : memref<64x384xf32, #tpu.memory_space<vmem>>, vector<8x384xf32>
    %c0_54 = arith.constant 0 : index
    %c0_55 = arith.constant 0 : index
    %173 = vector.load %arg2[%c0_54, %c0_55] : memref<64x384xf32, #tpu.memory_space<vmem>>, vector<64x384xf32>
    %cst_56 = arith.constant dense<0.000000e+00> : vector<8x384xf32>
    %174 = tpu.matmul %170, %173, %cst_56 {dimension_numbers = #tpu.dot_dimension_numbers<[1], [0], [0], [1], [0, 0, 1, 1], [], []>} : vector<8x64xf32>, vector<64x384xf32>, vector<8x384xf32> -> vector<8x384xf32>
    %175 = vector.extract_strided_slice %172 {offsets = [0, 0], sizes = [8, 64], strides = [1, 1]} : vector<8x384xf32> to vector<8x64xf32>
    %176 = vector.extract_strided_slice %174 {offsets = [0, 0], sizes = [8, 64], strides = [1, 1]} : vector<8x384xf32> to vector<8x64xf32>
    %177 = arith.addf %175, %176 : vector<8x64xf32>
    %178 = arith.negf %177 : vector<8x64xf32>
    %179 = math.exp %178 : vector<8x64xf32>
    %cst_57 = arith.constant 1.000000e+00 : f32
    %180 = vector.broadcast %cst_57 : f32 to vector<8x64xf32>
    %181 = arith.addf %180, %179 : vector<8x64xf32>
    %182 = arith.divf %180, %181 : vector<8x64xf32>
    %183 = vector.extract_strided_slice %172 {offsets = [0, 128], sizes = [8, 64], strides = [1, 1]} : vector<8x384xf32> to vector<8x64xf32>
    %184 = vector.extract_strided_slice %174 {offsets = [0, 128], sizes = [8, 64], strides = [1, 1]} : vector<8x384xf32> to vector<8x64xf32>
    %185 = arith.addf %183, %184 : vector<8x64xf32>
    %186 = arith.negf %185 : vector<8x64xf32>
    %187 = math.exp %186 : vector<8x64xf32>
    %cst_58 = arith.constant 1.000000e+00 : f32
    %188 = vector.broadcast %cst_58 : f32 to vector<8x64xf32>
    %189 = arith.addf %188, %187 : vector<8x64xf32>
    %190 = arith.divf %188, %189 : vector<8x64xf32>
    %191 = vector.extract_strided_slice %172 {offsets = [0, 256], sizes = [8, 64], strides = [1, 1]} : vector<8x384xf32> to vector<8x64xf32>
    %192 = vector.extract_strided_slice %174 {offsets = [0, 256], sizes = [8, 64], strides = [1, 1]} : vector<8x384xf32> to vector<8x64xf32>
    %193 = vector.broadcast %21 : vector<1x64xf32> to vector<8x64xf32>
    %194 = arith.addf %192, %193 : vector<8x64xf32>
    %195 = arith.mulf %182, %194 : vector<8x64xf32>
    %196 = arith.addf %191, %195 : vector<8x64xf32>
    %197 = math.tanh %196 : vector<8x64xf32>
    %cst_59 = arith.constant 1.000000e+00 : f32
    %198 = vector.broadcast %cst_59 : f32 to vector<8x64xf32>
    %199 = arith.subf %198, %190 : vector<8x64xf32>
    %200 = arith.mulf %199, %197 : vector<8x64xf32>
    %201 = arith.mulf %190, %170 : vector<8x64xf32>
    %202 = arith.addf %200, %201 : vector<8x64xf32>
    %c40_60 = arith.constant 40 : index
    %c0_61 = arith.constant 0 : index
    %203 = vector.load %arg7[%c40_60, %c0_61] : memref<64x64xf32, #tpu.memory_space<vmem>>, vector<8x64xf32>
    tpu.vector_store %arg7[%c40_60, %c0_61], %202 {strides = array<i32>} : memref<64x64xf32, #tpu.memory_space<vmem>>, vector<8x64xf32>,
    %c48 = arith.constant 48 : index
    %c0_62 = arith.constant 0 : index
    %204 = vector.load %arg6[%c48, %c0_62] : memref<64x384xf32, #tpu.memory_space<vmem>>, vector<8x384xf32>
    %c0_63 = arith.constant 0 : index
    %c0_64 = arith.constant 0 : index
    %205 = vector.load %arg2[%c0_63, %c0_64] : memref<64x384xf32, #tpu.memory_space<vmem>>, vector<64x384xf32>
    %cst_65 = arith.constant dense<0.000000e+00> : vector<8x384xf32>
    %206 = tpu.matmul %202, %205, %cst_65 {dimension_numbers = #tpu.dot_dimension_numbers<[1], [0], [0], [1], [0, 0, 1, 1], [], []>} : vector<8x64xf32>, vector<64x384xf32>, vector<8x384xf32> -> vector<8x384xf32>
    %207 = vector.extract_strided_slice %204 {offsets = [0, 0], sizes = [8, 64], strides = [1, 1]} : vector<8x384xf32> to vector<8x64xf32>
    %208 = vector.extract_strided_slice %206 {offsets = [0, 0], sizes = [8, 64], strides = [1, 1]} : vector<8x384xf32> to vector<8x64xf32>
    %209 = arith.addf %207, %208 : vector<8x64xf32>
    %210 = arith.negf %209 : vector<8x64xf32>
    %211 = math.exp %210 : vector<8x64xf32>
    %cst_66 = arith.constant 1.000000e+00 : f32
    %212 = vector.broadcast %cst_66 : f32 to vector<8x64xf32>
    %213 = arith.addf %212, %211 : vector<8x64xf32>
    %214 = arith.divf %212, %213 : vector<8x64xf32>
    %215 = vector.extract_strided_slice %204 {offsets = [0, 128], sizes = [8, 64], strides = [1, 1]} : vector<8x384xf32> to vector<8x64xf32>
    %216 = vector.extract_strided_slice %206 {offsets = [0, 128], sizes = [8, 64], strides = [1, 1]} : vector<8x384xf32> to vector<8x64xf32>
    %217 = arith.addf %215, %216 : vector<8x64xf32>
    %218 = arith.negf %217 : vector<8x64xf32>
    %219 = math.exp %218 : vector<8x64xf32>
    %cst_67 = arith.constant 1.000000e+00 : f32
    %220 = vector.broadcast %cst_67 : f32 to vector<8x64xf32>
    %221 = arith.addf %220, %219 : vector<8x64xf32>
    %222 = arith.divf %220, %221 : vector<8x64xf32>
    %223 = vector.extract_strided_slice %204 {offsets = [0, 256], sizes = [8, 64], strides = [1, 1]} : vector<8x384xf32> to vector<8x64xf32>
    %224 = vector.extract_strided_slice %206 {offsets = [0, 256], sizes = [8, 64], strides = [1, 1]} : vector<8x384xf32> to vector<8x64xf32>
    %225 = vector.broadcast %21 : vector<1x64xf32> to vector<8x64xf32>
    %226 = arith.addf %224, %225 : vector<8x64xf32>
    %227 = arith.mulf %214, %226 : vector<8x64xf32>
    %228 = arith.addf %223, %227 : vector<8x64xf32>
    %229 = math.tanh %228 : vector<8x64xf32>
    %cst_68 = arith.constant 1.000000e+00 : f32
    %230 = vector.broadcast %cst_68 : f32 to vector<8x64xf32>
    %231 = arith.subf %230, %222 : vector<8x64xf32>
    %232 = arith.mulf %231, %229 : vector<8x64xf32>
    %233 = arith.mulf %222, %202 : vector<8x64xf32>
    %234 = arith.addf %232, %233 : vector<8x64xf32>
    %c48_69 = arith.constant 48 : index
    %c0_70 = arith.constant 0 : index
    %235 = vector.load %arg7[%c48_69, %c0_70] : memref<64x64xf32, #tpu.memory_space<vmem>>, vector<8x64xf32>
    tpu.vector_store %arg7[%c48_69, %c0_70], %234 {strides = array<i32>} : memref<64x64xf32, #tpu.memory_space<vmem>>, vector<8x64xf32>,
    %c56 = arith.constant 56 : index
    %c0_71 = arith.constant 0 : index
    %236 = vector.load %arg6[%c56, %c0_71] : memref<64x384xf32, #tpu.memory_space<vmem>>, vector<8x384xf32>
    %c0_72 = arith.constant 0 : index
    %c0_73 = arith.constant 0 : index
    %237 = vector.load %arg2[%c0_72, %c0_73] : memref<64x384xf32, #tpu.memory_space<vmem>>, vector<64x384xf32>
    %cst_74 = arith.constant dense<0.000000e+00> : vector<8x384xf32>
    %238 = tpu.matmul %234, %237, %cst_74 {dimension_numbers = #tpu.dot_dimension_numbers<[1], [0], [0], [1], [0, 0, 1, 1], [], []>} : vector<8x64xf32>, vector<64x384xf32>, vector<8x384xf32> -> vector<8x384xf32>
    %239 = vector.extract_strided_slice %236 {offsets = [0, 0], sizes = [8, 64], strides = [1, 1]} : vector<8x384xf32> to vector<8x64xf32>
    %240 = vector.extract_strided_slice %238 {offsets = [0, 0], sizes = [8, 64], strides = [1, 1]} : vector<8x384xf32> to vector<8x64xf32>
    %241 = arith.addf %239, %240 : vector<8x64xf32>
    %242 = arith.negf %241 : vector<8x64xf32>
    %243 = math.exp %242 : vector<8x64xf32>
    %cst_75 = arith.constant 1.000000e+00 : f32
    %244 = vector.broadcast %cst_75 : f32 to vector<8x64xf32>
    %245 = arith.addf %244, %243 : vector<8x64xf32>
    %246 = arith.divf %244, %245 : vector<8x64xf32>
    %247 = vector.extract_strided_slice %236 {offsets = [0, 128], sizes = [8, 64], strides = [1, 1]} : vector<8x384xf32> to vector<8x64xf32>
    %248 = vector.extract_strided_slice %238 {offsets = [0, 128], sizes = [8, 64], strides = [1, 1]} : vector<8x384xf32> to vector<8x64xf32>
    %249 = arith.addf %247, %248 : vector<8x64xf32>
    %250 = arith.negf %249 : vector<8x64xf32>
    %251 = math.exp %250 : vector<8x64xf32>
    %cst_76 = arith.constant 1.000000e+00 : f32
    %252 = vector.broadcast %cst_76 : f32 to vector<8x64xf32>
    %253 = arith.addf %252, %251 : vector<8x64xf32>
    %254 = arith.divf %252, %253 : vector<8x64xf32>
    %255 = vector.extract_strided_slice %236 {offsets = [0, 256], sizes = [8, 64], strides = [1, 1]} : vector<8x384xf32> to vector<8x64xf32>
    %256 = vector.extract_strided_slice %238 {offsets = [0, 256], sizes = [8, 64], strides = [1, 1]} : vector<8x384xf32> to vector<8x64xf32>
    %257 = vector.broadcast %21 : vector<1x64xf32> to vector<8x64xf32>
    %258 = arith.addf %256, %257 : vector<8x64xf32>
    %259 = arith.mulf %246, %258 : vector<8x64xf32>
    %260 = arith.addf %255, %259 : vector<8x64xf32>
    %261 = math.tanh %260 : vector<8x64xf32>
    %cst_77 = arith.constant 1.000000e+00 : f32
    %262 = vector.broadcast %cst_77 : f32 to vector<8x64xf32>
    %263 = arith.subf %262, %254 : vector<8x64xf32>
    %264 = arith.mulf %263, %261 : vector<8x64xf32>
    %265 = arith.mulf %254, %234 : vector<8x64xf32>
    %266 = arith.addf %264, %265 : vector<8x64xf32>
    %c56_78 = arith.constant 56 : index
    %c0_79 = arith.constant 0 : index
    %267 = vector.load %arg7[%c56_78, %c0_79] : memref<64x64xf32, #tpu.memory_space<vmem>>, vector<8x64xf32>
    tpu.vector_store %arg7[%c56_78, %c0_79], %266 {strides = array<i32>} : memref<64x64xf32, #tpu.memory_space<vmem>>, vector<8x64xf32>,
    %c0_80 = arith.constant 0 : index
    %c0_81 = arith.constant 0 : index
    %268 = vector.load %arg7[%c0_80, %c0_81] : memref<64x64xf32, #tpu.memory_space<vmem>>, vector<64x64xf32>
    %c0_82 = arith.constant 0 : index
    %c0_83 = arith.constant 0 : index
    %269 = vector.load %arg3[%c0_82, %c0_83] : memref<64x128xf32, #tpu.memory_space<vmem>>, vector<64x128xf32>
    %cst_84 = arith.constant dense<0.000000e+00> : vector<64x128xf32>
    %270 = tpu.matmul %268, %269, %cst_84 {dimension_numbers = #tpu.dot_dimension_numbers<[1], [0], [0], [1], [0, 0, 1, 1], [], []>} : vector<64x64xf32>, vector<64x128xf32>, vector<64x128xf32> -> vector<64x128xf32>
    %c1_85 = arith.constant 1 : index
    %c0_86 = arith.constant 0 : index
    %271 = vector.load %arg4[%c1_85, %c0_86] : memref<8x128xf32, #tpu.memory_space<vmem>>, vector<1x128xf32>
    %272 = vector.broadcast %271 : vector<1x128xf32> to vector<64x128xf32>
    %273 = arith.addf %270, %272 : vector<64x128xf32>
    %274 = arith.negf %273 : vector<64x128xf32>
    %275 = math.exp %274 : vector<64x128xf32>
    %cst_87 = arith.constant 1.000000e+00 : f32
    %276 = vector.broadcast %cst_87 : f32 to vector<64x128xf32>
    %277 = arith.addf %276, %275 : vector<64x128xf32>
    %278 = arith.divf %276, %277 : vector<64x128xf32>
    %c0_88 = arith.constant 0 : index
    %c0_89 = arith.constant 0 : index
    %279 = vector.load %arg5[%c0_88, %c0_89] : memref<64x128xf32, #tpu.memory_space<vmem>>, vector<64x128xf32>
    tpu.vector_store %arg5[%c0_88, %c0_89], %278 {strides = array<i32>} : memref<64x128xf32, #tpu.memory_space<vmem>>, vector<64x128xf32>,
    return
  }
}

</mosaic_0001>

<bundles_post_ra>
// kernel: tpu_custom_call.1
= control target key start
LH: loop header
LB: loop body
LE: loop exit
PB: predicated region body
PF: predicated region fallthrough
CT: control target
= control target key end

     0   :  { %10 = vsyncpa [#allocation5], 0  ;;  %s3335_s0 = inlined_call_operand.vmem [shape: s32[64,4], index: 0, kind: input, shape index: {}]   ;;  %s3336_s1 = inlined_call_operand.hbm [shape: f32[64,384], index: 1, kind: input, shape index: {}]   ;;  %s3337_s2 = inlined_call_operand.hbm [shape: f32[64,384], index: 2, kind: input, shape index: {}]   ;;  %s3338_s3 = inlined_call_operand.vmem [shape: f32[64,128], index: 3, kind: input, shape index: {}]   ;;  %s3339_s4 = inlined_call_operand.vmem [shape: f32[8,128], index: 4, kind: input, shape index: {}]   ;;  %s3340_s5 = inlined_call_operand.hbm [shape: f32[64,128], index: 5, kind: output, shape index: {}]  }
   0x1   :  { %11 = vsyncpa [#allocation8], 0 }
   0x2   :  { %12 = vsyncpa [#allocation6], 0  ;;  %s2697_s18 = smov [#allocation4]  }
   0x3   :  { %s20_s19 = sshll.u32 %s2697_s18, 4  ;;  %s21_s19 = int_to_ptr.vmem [resolvable:$true] %s20_s19 }
   0x4   :  { %s2639_s20 = scalar_lea.vmem %s21_s19, 3072  ;;  %p2644_p1 = scmp.lt.s32.totalorder %s21_s19, %s21_s19 }
   0x5   :  { %p2640_p0 = scmp.ne.s32.totalorder %s21_s19, %s2639_s20  ;;  %p2645_p2 = scmp.lt.s32.totalorder %s2639_s20, %s2639_s20 }
   0x7   :  { %p2646_p3 = por %p2645_p2, %p2644_p1 }
   0x9   :  { %p2647_p4 = pnand %p2646_p3, %p2640_p0 }
   0xb   :  { %2650 = shalt.err (!%p2647_p4)
}
   0xc   :  { %s2698_s21 = smov 384   ;;  %s2699_s22 = smov 24  }
   0xd   :  { %26 = dma.hbm_to_vmem [thread:$0]  %s3336_s1, 3072, %s21_s19, [#allocation5], %s2698_s21, %s2698_s21, %s2699_s22  }
   0xe   :  { %s2700_s25 = smov [#allocation7]  }
   0xf   :  { %s32_s26 = sshll.u32 %s2700_s25, 4  ;;  %s33_s26 = int_to_ptr.vmem [resolvable:$true] %s32_s26 }
  0x10   :  { %s2659_s27 = scalar_lea.vmem %s33_s26, 3072  ;;  %p2664_p6 = scmp.lt.s32.totalorder %s33_s26, %s33_s26 }
  0x11   :  { %p2660_p5 = scmp.ne.s32.totalorder %s33_s26, %s2659_s27  ;;  %p2665_p7 = scmp.lt.s32.totalorder %s2659_s27, %s2659_s27 }
  0x13   :  { %p2666_p8 = por %p2665_p7, %p2664_p6 }
  0x15   :  { %p2667_p9 = pnand %p2666_p8, %p2660_p5 }
  0x17   :  { %2670 = shalt.err (!%p2667_p9)
}
  0x18   :  { %38 = dma.hbm_to_vmem [thread:$0]  %s3337_s2, 3072, %s33_s26, [#allocation8], %s2698_s21, %s2698_s21, %s2699_s22  }
  0x19   :  { %2691 = dma.done.wait [#allocation5], 3072  }
  0x1a   :  { %2692 = vsyncadd [#allocation5], 4294964224 }
  0x1b   :  { %2693 = dma.done.wait [#allocation8], 3072  }
  0x1c   :  { %2694 = vsyncadd [#allocation8], 4294964224  ;;  %v2701_v0 = vmov 2   ;;  %v2702_v1 = vmov 0   ;;  %v51_v2 = vld [vmem:[%s3335_s0] sm:$0xff]  ;;  %v249_v3 = vld [vmem:[#allocation4 + $0xb0] sm:$0xff]  ;;  %v49_v37 = vlaneseq }
  0x1d   :  { %2497 = vset.pattern.permute.xlu1 %v2701_v0  ;;  %2495 = vset.pattern.permute.xlu0 %v2702_v1  ;;  %v248_v4 = vld [vmem:[#allocation4 + $0xa8] sm:$0xff]  ;;  %v246_v5 = vld [vmem:[#allocation4 + $0x98] sm:$0xff]  ;;  %v245_v6 = vld [vmem:[#allocation4 + $0x90] sm:$0xff]  ;;  %v2703_v8 = vmov 0.0   ;;  %v2704_v9 = vmov 3   ;;  %v2705_v10 = vmov 1  }
  0x1e   :  { %132 = vperm.xlu1 %2497, %v51_v2   ;;  %60 = vperm.xlu0 %2495, %v51_v2   ;;  %v250_v7 = vld [vmem:[#allocation4 + $0xb8] sm:$0xff]  ;;  %v243_v11 = vld [vmem:[#allocation4 + $0x80] sm:$0xff]  ;;  %v52_v14 = vld [vmem:[%s3335_s0 + $0x8] sm:$0xff]  ;;  %v2796_v40 = vand.u32 127, %v49_v37  ;;  %vm251_vm6 = vcmask 523264  }
  0x1f   :  { %292 = vmatprep.subr.mxu0 %v249_v3  ;;  %340 = vmatprep.mubr.f32.mxu0 %v2703_v8  ;;  %v242_v12 = vld [vmem:[#allocation4 + $0x78] sm:$0xff]  ;;  %v247_v13 = vld [vmem:[#allocation4 + $0xa0] sm:$0xff]  ;;  %v240_v15 = vld [vmem:[#allocation4 + $0x68] sm:$0xff] }
  0x20   :  { %293 = vmatpush1.msra.mxu0 %v248_v4  ;;  %2293 = vmatprep.subr.mxu1 %v250_v7  ;;  %v239_v16 = vld [vmem:[#allocation4 + $0x60] sm:$0xff]  ;;  %v237_v17 = vld [vmem:[#allocation4 + $0x50] sm:$0xff]  ;;  %v244_v18 = vld [vmem:[#allocation4 + $0x88] sm:$0xff] }
  0x21   :  { %294 = vmatprep.subr.mxu0 %v246_v5  ;;  %2294 = vmatpush3.msra.mxu1 %v250_v7  ;;  %v236_v19 = vld [vmem:[#allocation4 + $0x48] sm:$0xff]  ;;  %v234_v20 = vld [vmem:[#allocation4 + $0x38] sm:$0xff]  ;;  %v233_v21 = vld [vmem:[#allocation4 + $0x30] sm:$0xff] }
  0x22   :  { %2498 = vset.pattern.permute.xlu1 %v2704_v9  ;;  %2496 = vset.pattern.permute.xlu0 %v2705_v10  ;;  %v231_v22 = vld [vmem:[#allocation4 + $0x20] sm:$0xff]  ;;  %v241_v23 = vld [vmem:[#allocation4 + $0x70] sm:$0xff]  ;;  %v230_v24 = vld [vmem:[#allocation4 + $0x18] sm:$0xff] }
  0x23   :  { %172 = vperm.xlu1 %2498, %v51_v2   ;;  %92 = vperm.xlu0 %2496, %v51_v2   ;;  %v228_v25 = vld [vmem:[#allocation4 + $0x8] sm:$0xff]  ;;  %v238_v26 = vld [vmem:[#allocation4 + $0x58] sm:$0xff]  ;;  %v227_v27 = vld [vmem:[#allocation4] sm:$0xff] }
  0x24   :  { %295 = vmatpush1.msra.mxu0 %v245_v6  ;;  %2295 = vmatprep.subr.mxu1 %v247_v13  ;;  %v235_v28 = vld [vmem:[#allocation4 + $0x40] sm:$0xff]  ;;  %v53_v29 = vld [vmem:[%s3335_s0 + $0x10] sm:$0xff]  ;;  %v232_v30 = vld [vmem:[#allocation4 + $0x28] sm:$0xff] }
  0x25   :  { %296 = vmatprep.subr.mxu0 %v243_v11  ;;  %2296 = vmatpush3.msra.mxu1 %v247_v13  ;;  %v54_v31 = vld [vmem:[%s3335_s0 + $0x18] sm:$0xff]  ;;  %v229_v32 = vld [vmem:[#allocation4 + $0x10] sm:$0xff]  ;;  %v55_v33 = vld [vmem:[%s3335_s0 + $0x20] sm:$0xff] }
  0x26   :  { %297 = vmatpush1.msra.mxu0 %v242_v12  ;;  %2297 = vmatprep.subr.mxu1 %v244_v18  ;;  %v56_v34 = vld [vmem:[%s3335_s0 + $0x28] sm:$0xff]  ;;  %v57_v35 = vld [vmem:[%s3335_s0 + $0x30] sm:$0xff]  ;;  %v58_v36 = vld [vmem:[%s3335_s0 + $0x38] sm:$0xff] }
  0x27   :  { %2499 = vset.pattern.permute.xlu1 %v2702_v1  ;;  %95 = vperm.xlu0 %2496, %v52_v14   ;;  %v2930_v37 = vld [vmem:[#allocation7 + $0x8] sm:$0xff] }
  0x28   :  { %63 = vperm.xlu1 %2499, %v52_v14   ;;  %298 = vmatprep.subr.mxu0 %v240_v15 }
  0x29   :  { %299 = vmatpush1.msra.mxu0 %v239_v16  ;;  %2298 = vmatpush3.msra.mxu1 %v244_v18  ;;  %v2862_v16 = vld [vmem:[#allocation7 + $0xb0] sm:$0xff]  ;;  %v2867_v18 = vld [vmem:[#allocation7 + $0xb8] sm:$0xff] }
  0x2a   :  { %300 = vmatprep.subr.mxu0 %v237_v17  ;;  %2299 = vmatprep.subr.mxu1 %v241_v23  ;;  %v2865_v17 = vld [vmem:[#allocation7 + $0xa8] sm:$0xff] }
  0x2b   :  { %2501 = vset.pattern.permute.xlu0 %v2704_v9  ;;  %301 = vmatpush1.msra.mxu0 %v236_v19  ;;  %v2870_v19 = vld [vmem:[#allocation7 + $0x98] sm:$0xff] }
  0x2c   :  { %2500 = vset.pattern.permute.xlu1 %v2701_v0  ;;  %175 = vperm.xlu0 %2501, %v52_v14  }
  0x2d   :  { %135 = vperm.xlu1 %2500, %v52_v14   ;;  %302 = vmatprep.subr.mxu0 %v234_v20  ;;  %v2874_v20 = vld [vmem:[#allocation7 + $0x90] sm:$0xff] }
  0x2e   :  { %303 = vmatpush1.msra.mxu0 %v233_v21  ;;  %2300 = vmatpush3.msra.mxu1 %v241_v23  ;;  %v2877_v21 = vld [vmem:[#allocation7 + $0xa0] sm:$0xff]  ;;  %v2884_v23 = vld [vmem:[#allocation7 + $0x78] sm:$0xff] }
  0x2f   :  { %304 = vmatprep.subr.mxu0 %v231_v22  ;;  %2301 = vmatprep.subr.mxu1 %v238_v26  ;;  %v2880_v22 = vld [vmem:[#allocation7 + $0x80] sm:$0xff] }
  0x30   :  { %305 = vmatpush1.msra.mxu0 %v230_v24  ;;  %2302 = vmatpush3.msra.mxu1 %v238_v26  ;;  %v2887_v24 = vld [vmem:[#allocation7 + $0x88] sm:$0xff]  ;;  %v2894_v26 = vld [vmem:[#allocation7 + $0x60] sm:$0xff] }
  0x31   :  { %306 = vmatprep.subr.mxu0 %v228_v25  ;;  %2303 = vmatprep.subr.mxu1 %v235_v28  ;;  %v2890_v25 = vld [vmem:[#allocation7 + $0x68] sm:$0xff] }
  0x32   :  { %307 = vmatpush1.msra.mxu0 %v227_v27  ;;  %2502 = vset.pattern.permute.xlu1 %v2702_v1  ;;  %v2897_v27 = vld [vmem:[#allocation7 + $0x70] sm:$0xff] }
  0x33   :  { %2304 = vmatpush3.msra.mxu1 %v235_v28  ;;  %66 = vperm.xlu1 %2502, %v53_v29   ;;  %v2900_v28 = vld [vmem:[#allocation7 + $0x50] sm:$0xff] }
  0x34   :  { %2305 = vmatprep.subr.mxu1 %v232_v30  ;;  %2504 = vset.pattern.permute.xlu0 %v2702_v1 }
  0x35   :  { %2306 = vmatpush3.msra.mxu1 %v232_v30  ;;  %69 = vperm.xlu0 %2504, %v54_v31   ;;  %v2907_v30 = vld [vmem:[#allocation7 + $0x58] sm:$0xff] }
  0x36   :  { %2307 = vmatprep.subr.mxu1 %v229_v32  ;;  %2321 = vmatprep.subr.mxu0 %v2703_v8 }
  0x37   :  { %2308 = vmatpush3.msra.mxu1 %v229_v32  ;;  %2503 = vset.pattern.permute.xlu1 %v2705_v10  ;;  %v2914_v32 = vld [vmem:[#allocation7 + $0x30] sm:$0xff] }
  0x38   :  { %98 = vperm.xlu1 %2503, %v53_v29   ;;  %590 = vmatprep.subr.mxu1 %v2862_v16 }
  0x39   :  { %72 = vperm.xlu0 %2504, %v55_v33  }
  0x3c   :  { %101 = vperm.xlu1 %2503, %v54_v31  }
  0x3d   :  { %2510 = vset.pattern.permute.xlu0 %v2704_v9 }
  0x3e   :  { %184 = vperm.xlu0 %2510, %v55_v33  }
  0x40   :  { %2505 = vset.pattern.permute.xlu1 %v2701_v0 }
  0x41   :  { %138 = vperm.xlu1 %2505, %v53_v29  }
  0x42   :  { %2511 = vset.pattern.permute.xlu0 %v2705_v10 }
  0x43   :  { %107 = vperm.xlu0 %2511, %v56_v34  }
  0x45   :  { %2506 = vset.pattern.permute.xlu1 %v2704_v9 }
  0x46   :  { %178 = vperm.xlu1 %2506, %v53_v29   ;;  %v2904_v29 = vld [vmem:[#allocation7 + $0x48] sm:$0xff] }
  0x47   :  { %110 = vperm.xlu0 %2511, %v57_v35  }
  0x4a   :  { %181 = vperm.xlu1 %2506, %v54_v31  }
  0x4b   :  { %2514 = vset.pattern.permute.xlu0 %v2701_v0 }
  0x4c   :  { %141 = vperm.xlu0 %2514, %v54_v31   ;;  %v2910_v31 = vld [vmem:[#allocation7 + $0x38] sm:$0xff] }
  0x4e   :  { %2507 = vset.pattern.permute.xlu1 %v2705_v10 }
  0x4f   :  { %104 = vperm.xlu1 %2507, %v55_v33  }
  0x50   :  { %150 = vperm.xlu0 %2514, %v57_v35  }
  0x53   :  { %2508 = vset.pattern.permute.xlu1 %v2702_v1 }
  0x54   :  { %75 = vperm.xlu1 %2508, %v56_v34   ;;  %2518 = vset.pattern.permute.xlu0 %v2704_v9 }
  0x55   :  { %193 = vperm.xlu0 %2518, %v58_v36  }
  0x58   :  { %2509 = vset.pattern.permute.xlu1 %v2701_v0 }
  0x59   :  { %144 = vperm.xlu1 %2509, %v55_v33   ;;  %v2917_v33 = vld [vmem:[#allocation7 + $0x40] sm:$0xff] }
  0x5d   :  { %147 = vperm.xlu1 %2509, %v56_v34  }
  0x61   :  { %2512 = vset.pattern.permute.xlu1 %v2704_v9 }
  0x62   :  { %187 = vperm.xlu1 %2512, %v56_v34   ;;  %v2920_v34 = vld [vmem:[#allocation7 + $0x20] sm:$0xff] }
  0x66   :  { %2513 = vset.pattern.permute.xlu1 %v2702_v1 }
  0x67   :  { %78 = vperm.xlu1 %2513, %v57_v35  }
  0x6b   :  { %81 = vperm.xlu1 %2513, %v58_v36  }
  0x6f   :  { %2515 = vset.pattern.permute.xlu1 %v2705_v10 }
  0x70   :  { %113 = vperm.xlu1 %2515, %v58_v36  }
  0x74   :  { %2516 = vset.pattern.permute.xlu1 %v2701_v0 }
  0x75   :  { %153 = vperm.xlu1 %2516, %v58_v36   ;;  %v2927_v36 = vld [vmem:[#allocation7 + $0x28] sm:$0xff] }
  0x79   :  { %2517 = vset.pattern.permute.xlu1 %v2704_v9 }
  0x7a   :  { %190 = vperm.xlu1 %2517, %v57_v35   ;;  %v2924_v35 = vld [vmem:[#allocation7 + $0x18] sm:$0xff] }
  0x99   :  { %v61_v38 = vpop.permute.xlu0 %60  ;;  %v133_v39 = vpop.permute.xlu1 %132 }
  0x9a   :  { %vm83_vm0 = vcmp.eq.s32.totalorder %v61_v38, %v2796_v40  ;;  %vm155_vm3 = vcmp.eq.s32.totalorder %v133_v39, %v2796_v40  ;;  %v2934_v38 = vld [vmem:[#allocation7] sm:$0xff]  ;;  %v2937_v39 = vld [vmem:[#allocation7 + $0x10] sm:$0xff] }
  0x9e   :  { %v93_v41 = vpop.permute.xlu0 %92  ;;  %v173_v42 = vpop.permute.xlu1 %172 }
  0x9f   :  { %vm115_vm1 = vcmp.eq.s32.totalorder %v93_v41, %v2796_v40  ;;  %vm195_vm2 = vcmp.eq.s32.totalorder %v173_v42, %v2796_v40 }
  0xa0   :  { %vm123_vm4 = vmor %vm83_vm0, %vm115_vm1 }
  0xa1   :  { %vm163_vm5 = vmor %vm123_vm4, %vm155_vm3 }
  0xa2   :  { %vm203_vm7 = vmor %vm163_vm5, %vm195_vm2  ;;  %v96_v44 = vpop.permute.xlu0 %95 }
  0xa3   :  { %v2126_v43 = vsel %vm203_vm7, 1.0, %v2703_v8  ;;  %v64_v45 = vpop.permute.xlu1 %63  ;;  %vm116_vm8 = vcmp.eq.s32.totalorder %v96_v44, %v2796_v40 }
  0xa4   :  { %2134 = vmatmul.mubr.msk.f32.vlgmr.msra.gmra.mxu0 %vm251_vm6, %v2126_v43  ;;  %2309 = vmatprep.mubr.msk.f32.mxu1 %vm251_vm6, %v2126_v43  ;;  %vm84_vm9 = vcmp.eq.s32.totalorder %v64_v45, %v2796_v40 }
  0xa5   :  { %346 = vmatprep.mubr.f32.mxu0 %v2703_v8  ;;  %vm124_vm11 = vmor %vm84_vm9, %vm116_vm8  ;;  %2322 = vmatpush3.msra.mxu0 %v2867_v18 }
  0xa6   :  { %2323 = vmatprep.subr.mxu0 %v2703_v8 }
  0xa7   :  { %v176_v46 = vpop.permute.xlu0 %175  ;;  %2324 = vmatpush3.msra.mxu0 %v2877_v21 }
  0xa8   :  { %v136_v47 = vpop.permute.xlu1 %135  ;;  %vm196_vm10 = vcmp.eq.s32.totalorder %v176_v46, %v2796_v40  ;;  %2325 = vmatprep.subr.mxu0 %v2703_v8 }
  0xa9   :  { %vm156_vm12 = vcmp.eq.s32.totalorder %v136_v47, %v2796_v40  ;;  %2326 = vmatpush3.msra.mxu0 %v2887_v24 }
  0xaa   :  { %vm164_vm13 = vmor %vm124_vm11, %vm156_vm12  ;;  %2327 = vmatprep.subr.mxu0 %v2703_v8 }
  0xab   :  { %vm204_vm14 = vmor %vm164_vm13, %vm196_vm10  ;;  %2328 = vmatpush3.msra.mxu0 %v2897_v27 }
  0xac   :  { %v2127_v48 = vsel %vm204_vm14, 1.0, %v2703_v8  ;;  %2329 = vmatprep.subr.mxu0 %v2703_v8 }
  0xad   :  { %2135 = vmatmul.mubr.msk.f32.gmra.mxu0 %vm251_vm6, %v2127_v48  ;;  %2310 = vmatmul.mubr.msk.f32.vlgmr.msra.gmra.mxu1 %vm251_vm6, %v2127_v48 }
  0xae   :  { %352 = vmatprep.mubr.f32.mxu0 %v2703_v8  ;;  %v67_v49 = vpop.permute.xlu1 %66  ;;  %591 = vmatpush1.msra.mxu1 %v2865_v17 }
  0xaf   :  { %vm85_vm15 = vcmp.eq.s32.totalorder %v67_v49, %v2796_v40  ;;  %592 = vmatprep.subr.mxu1 %v2870_v19  ;;  %2330 = vmatpush3.msra.mxu0 %v2907_v30  ;;  %v2950_v49 = vld [vmem:[%s3339_s4] ss:$0 sm:$0xff] }
  0xb0   :  { %v70_v50 = vpop.permute.xlu0 %69  ;;  %593 = vmatpush1.msra.mxu1 %v2874_v20  ;;  %2331 = vmatprep.subr.mxu0 %v2703_v8 }
  0xb1   :  { %vm86_vm5 = vcmp.eq.s32.totalorder %v70_v50, %v2796_v40  ;;  %594 = vmatprep.subr.mxu1 %v2880_v22  ;;  %2332 = vmatpush3.msra.mxu0 %v2917_v33 }
  0xb2   :  { %595 = vmatpush1.msra.mxu1 %v2884_v23  ;;  %2333 = vmatprep.subr.mxu0 %v2703_v8 }
  0xb3   :  { %v99_v51 = vpop.permute.xlu1 %98  ;;  %596 = vmatprep.subr.mxu1 %v2890_v25  ;;  %2334 = vmatpush3.msra.mxu0 %v2927_v36 }
  0xb4   :  { %v73_v52 = vpop.permute.xlu0 %72  ;;  %vm117_vm0 = vcmp.eq.s32.totalorder %v99_v51, %v2796_v40  ;;  %597 = vmatpush1.msra.mxu1 %v2894_v26  ;;  %2335 = vmatprep.subr.mxu0 %v2703_v8 }
  0xb5   :  { %vm125_vm1 = vmor %vm85_vm15, %vm117_vm0  ;;  %vm87_vm14 = vcmp.eq.s32.totalorder %v73_v52, %v2796_v40  ;;  %598 = vmatprep.subr.mxu1 %v2900_v28  ;;  %2336 = vmatpush3.msra.mxu0 %v2937_v39 }
  0xb6   :  { %599 = vmatpush1.msra.mxu1 %v2904_v29  ;;  %2340 = vmatprep.subr.mxu0 %v2703_v8 }
  0xb7   :  { %v102_v53 = vpop.permute.xlu1 %101  ;;  %600 = vmatprep.subr.mxu1 %v2910_v31 }
  0xb8   :  { %vm118_vm7 = vcmp.eq.s32.totalorder %v102_v53, %v2796_v40  ;;  %601 = vmatpush1.msra.mxu1 %v2914_v32 }
  0xb9   :  { %v185_v54 = vpop.permute.xlu0 %184  ;;  %vm126_vm9 = vmor %vm86_vm5, %vm118_vm7  ;;  %602 = vmatprep.subr.mxu1 %v2920_v34 }
  0xba   :  { %603 = vmatpush1.msra.mxu1 %v2924_v35 }
  0xbb   :  { %604 = vmatprep.subr.mxu1 %v2930_v37 }
  0xbc   :  { %v139_v55 = vpop.permute.xlu1 %138  ;;  %605 = vmatpush1.msra.mxu1 %v2934_v38 }
  0xbd   :  { %vm157_vm2 = vcmp.eq.s32.totalorder %v139_v55, %v2796_v40  ;;  %784 = vmatprep.subr.mxu1 %v2862_v16 }
  0xbe   :  { %v108_v56 = vpop.permute.xlu0 %107  ;;  %vm165_vm3 = vmor %vm125_vm1, %vm157_vm2  ;;  %vm199_vm2 = vcmp.eq.s32.totalorder %v185_v54, %v2796_v40 }
  0xc1   :  { %v179_v57 = vpop.permute.xlu1 %178 }
  0xc2   :  { %vm197_vm4 = vcmp.eq.s32.totalorder %v179_v57, %v2796_v40  ;;  %v111_v58 = vpop.permute.xlu0 %110 }
  0xc3   :  { %vm205_vm8 = vmor %vm165_vm3, %vm197_vm4  ;;  %vm120_vm4 = vcmp.eq.s32.totalorder %v108_v56, %v2796_v40 }
  0xc4   :  { %v2128_v59 = vsel %vm205_vm8, 1.0, %v2703_v8 }
  0xc5   :  { %2136 = vmatmul.mubr.msk.f32.gmra.mxu0 %vm251_vm6, %v2128_v59  ;;  %v182_v60 = vpop.permute.xlu1 %181  ;;  %2312 = vmatprep.mubr.msk.f32.mxu1 %vm251_vm6, %v2128_v59 }
  0xc6   :  { %358 = vmatprep.mubr.f32.mxu0 %v2703_v8  ;;  %vm198_vm10 = vcmp.eq.s32.totalorder %v182_v60, %v2796_v40 }
  0xc7   :  { %v142_v61 = vpop.permute.xlu0 %141 }
  0xc8   :  { %vm158_vm11 = vcmp.eq.s32.totalorder %v142_v61, %v2796_v40 }
  0xc9   :  { %vm166_vm12 = vmor %vm126_vm9, %vm158_vm11 }
  0xca   :  { %vm206_vm13 = vmor %vm166_vm12, %vm198_vm10  ;;  %v105_v63 = vpop.permute.xlu1 %104 }
  0xcb   :  { %v2129_v62 = vsel %vm206_vm13, 1.0, %v2703_v8  ;;  %vm119_vm15 = vcmp.eq.s32.totalorder %v105_v63, %v2796_v40  ;;  %vm121_vm13 = vcmp.eq.s32.totalorder %v111_v58, %v2796_v40  ;;  %v151_v11 = vpop.permute.xlu0 %150 }
  0xcc   :  { %2137 = vmatmul.mubr.msk.f32.gmra.mxu0 %vm251_vm6, %v2129_v62  ;;  %2313 = vmatmul.mubr.msk.f32.gmra.mxu1 %vm251_vm6, %v2129_v62  ;;  %vm127_vm0 = vmor %vm87_vm14, %vm119_vm15 }
  0xcd   :  { %364 = vmatprep.mubr.f32.mxu0 %v2703_v8 }
  0xcf   :  { %v76_v0 = vpop.permute.xlu1 %75 }
  0xd0   :  { %vm88_vm5 = vcmp.eq.s32.totalorder %v76_v0, %v2796_v40  ;;  %v194_v14 = vpop.permute.xlu0 %193 }
  0xd1   :  { %vm128_vm8 = vmor %vm88_vm5, %vm120_vm4 }
  0xd4   :  { %v145_v1 = vpop.permute.xlu1 %144 }
  0xd5   :  { %vm159_vm1 = vcmp.eq.s32.totalorder %v145_v1, %v2796_v40 }
  0xd6   :  { %vm167_vm3 = vmor %vm127_vm0, %vm159_vm1  ;;  %vm161_vm0 = vcmp.eq.s32.totalorder %v151_v11, %v2796_v40 }
  0xd7   :  { %vm207_vm7 = vmor %vm167_vm3, %vm199_vm2 }
  0xd8   :  { %v148_v2 = vpop.permute.xlu1 %147  ;;  %v2130_v4 = vsel %vm207_vm7, 1.0, %v2703_v8 }
  0xd9   :  { %vm160_vm9 = vcmp.eq.s32.totalorder %v148_v2, %v2796_v40  ;;  %2138 = vmatmul.mubr.msk.f32.gmra.mxu0 %vm251_vm6, %v2130_v4  ;;  %2315 = vmatprep.mubr.msk.f32.mxu1 %vm251_vm6, %v2130_v4 }
  0xda   :  { %vm168_vm10 = vmor %vm128_vm8, %vm160_vm9  ;;  %370 = vmatprep.mubr.f32.mxu0 %v2703_v8 }
  0xdd   :  { %v188_v3 = vpop.permute.xlu1 %187 }
  0xde   :  { %vm200_vm11 = vcmp.eq.s32.totalorder %v188_v3, %v2796_v40 }
  0xdf   :  { %vm208_vm12 = vmor %vm168_vm10, %vm200_vm11  ;;  %vm202_vm10 = vcmp.eq.s32.totalorder %v194_v14, %v2796_v40 }
  0xe0   :  { %v2131_v6 = vsel %vm208_vm12, 1.0, %v2703_v8  ;;  %vm2706_vm12 = vmmov 0  }
  0xe1   :  { %2139 = vmatmul.mubr.msk.f32.gmra.mxu0 %vm251_vm6, %v2131_v6  ;;  %2316 = vmatmul.mubr.msk.f32.gmra.mxu1 %vm251_vm6, %v2131_v6 }
  0xe2   :  { %v79_v5 = vpop.permute.xlu1 %78  ;;  %376 = vmatprep.mubr.f32.mxu0 %v2703_v8 }
  0xe3   :  { %vm89_vm14 = vcmp.eq.s32.totalorder %v79_v5, %v2796_v40 }
  0xe4   :  { %vm129_vm15 = vmor %vm89_vm14, %vm121_vm13 }
  0xe5   :  { %vm169_vm1 = vmor %vm129_vm15, %vm161_vm0 }
  0xe6   :  { %v82_v7 = vpop.permute.xlu1 %81 }
  0xe7   :  { %vm90_vm4 = vcmp.eq.s32.totalorder %v82_v7, %v2796_v40 }
  0xeb   :  { %v114_v9 = vpop.permute.xlu1 %113 }
  0xec   :  { %vm122_vm5 = vcmp.eq.s32.totalorder %v114_v9, %v2796_v40 }
  0xed   :  { %vm130_vm7 = vmor %vm90_vm4, %vm122_vm5 }
  0xf0   :  { %v154_v10 = vpop.permute.xlu1 %153 }
  0xf1   :  { %vm162_vm8 = vcmp.eq.s32.totalorder %v154_v10, %v2796_v40 }
  0xf2   :  { %vm170_vm9 = vmor %vm130_vm7, %vm162_vm8 }
  0xf3   :  { %vm210_vm11 = vmor %vm170_vm9, %vm202_vm10 }
  0xf4   :  { %v2133_v15 = vsel %vm210_vm11, 1.0, %v2703_v8 }
  0xf5   :  { %v191_v12 = vpop.permute.xlu1 %190 }
  0xf6   :  { %vm201_vm2 = vcmp.eq.s32.totalorder %v191_v12, %v2796_v40 }
  0xf7   :  { %vm209_vm3 = vmor %vm169_vm1, %vm201_vm2 }
  0xf8   :  { %v2132_v13 = vsel %vm209_vm3, 1.0, %v2703_v8 }
  0xf9   :  { %2140 = vmatmul.mubr.msk.f32.gmra.mxu0 %vm251_vm6, %v2132_v13  ;;  %2318 = vmatprep.mubr.msk.f32.mxu1 %vm251_vm6, %v2132_v13 }
  0xfa   :  { %382 = vmatprep.mubr.f32.mxu0 %v2703_v8  ;;  %2319 = vmatmul.mubr.msk.f32.gmra.mxu1 %vm251_vm6, %v2133_v15 }
  0xfb   :  { %638 = vmatprep.mubr.f32.mxu1 %v2703_v8 }
  0xfd   :  { %2141 = vmatmul.mubr.msk.f32.gmra.mxu0 %vm251_vm6, %v2133_v15 }
  0xfe   :  { %2337 = vmatprep.mubr.msk.f32.mxu0 %vm2706_vm12, %v2703_v8 }
 0x164   :  { %v342_v40 = vpop.f32.mrf.mxu0 }
 0x165   :  { %v2150_v41 = vmul.f32 -1.442695, %v342_v40 }
 0x166   :  { %v344_v42 = vpop.f32.mrf.mxu0 }
 0x167   :  { %2519 = vpow2.f32 %v2150_v41  ;;  %v2151_v43 = vmul.f32 -1.442695, %v344_v42 }
 0x169   :  { %2521 = vpow2.f32 %v2151_v43 }
 0x16d   :  { %v2945_v48 = vpop.f32.mrf.mxu1  ;;  %v348_v58 = vpop.f32.mrf.mxu0 }
 0x16f   :  { %v455_v52 = vpop.f32.mrf.mxu1  ;;  %v350_v59 = vpop.f32.mrf.mxu0 }
 0x174   :  { %v2520_v44 = vpop.eup %2519 }
 0x175   :  { %v525_v45 = vadd.f32 1.0, %v2520_v44 }
 0x176   :  { %v2522_v46 = vpop.eup %2521 }
 0x177   :  { %2523 = vrcp.f32 %v525_v45  ;;  %v531_v47 = vadd.f32 1.0, %v2522_v46 }
 0x179   :  { %2525 = vrcp.f32 %v531_v47 }
 0x184   :  { %v2524_v50 = vpop.eup %2523 }
 0x185   :  { %v538_v51 = vmul.f32 %v2524_v50, %v2950_v49  ;;  %v2996_v60 = vpop.f32.mrf.mxu0 }
 0x186   :  { %v2526_v54 = vpop.eup %2525 }
 0x187   :  { %v539_v53 = vadd.f32 %v538_v51, %v455_v52  ;;  %v541_v55 = vsub.f32 1.0, %v2526_v54  ;;  %v2998_v61 = vpop.f32.mrf.mxu0 }
 0x189   :  { %2527 = vtanh.f32 %v539_v53 }
 0x18c   :  { %v3000_v62 = vpop.f32.mrf.mxu0  ;;  %v3010_v3 = vpop.f32.mrf.mxu1 }
 0x18e   :  { %v3002_v63 = vpop.f32.mrf.mxu0  ;;  %v3014_v5 = vpop.f32.mrf.mxu1 }
 0x196   :  { %v2528_v56 = vpop.eup %2527 }
 0x197   :  { %v2953_v57 = vmul.f32 %v2528_v56, %v541_v55 }
 0x199   :  { %543 = vst.msk [vmem:[#allocation3] sm:$0xff] %vm251_vm6, %v2953_v57  ;;  %2153 = vmatmul.mubr.msk.f32.vlgmr.msra.gmra.mxu1 %vm251_vm6, %v2953_v57  ;;  %2338 = vmatmul.mubr.msk.f32.vlgmr.msra.gmra.mxu0 %vm251_vm6, %v2953_v57  ;;  %v3004_v0 = vpop.f32.mrf.mxu0 }
 0x19a   :  { %785 = vmatpush1.msra.mxu1 %v2865_v17  ;;  %2341 = vmatpush3.msra.mxu0 %v2867_v18 }
 0x19b   :  { %786 = vmatprep.subr.mxu1 %v2870_v19  ;;  %2342 = vmatprep.subr.mxu0 %v2703_v8  ;;  %v3006_v1 = vpop.f32.mrf.mxu0 }
 0x19c   :  { %787 = vmatpush1.msra.mxu1 %v2874_v20  ;;  %2343 = vmatpush3.msra.mxu0 %v2877_v21 }
 0x19d   :  { %788 = vmatprep.subr.mxu1 %v2880_v22  ;;  %2344 = vmatprep.subr.mxu0 %v2703_v8 }
 0x19e   :  { %789 = vmatpush1.msra.mxu1 %v2884_v23  ;;  %2345 = vmatpush3.msra.mxu0 %v2887_v24 }
 0x19f   :  { %790 = vmatprep.subr.mxu1 %v2890_v25  ;;  %2346 = vmatprep.subr.mxu0 %v2703_v8 }
 0x1a0   :  { %791 = vmatpush1.msra.mxu1 %v2894_v26  ;;  %2347 = vmatpush3.msra.mxu0 %v2897_v27 }
 0x1a1   :  { %792 = vmatprep.subr.mxu1 %v2900_v28  ;;  %2348 = vmatprep.subr.mxu0 %v2703_v8  ;;  %v3008_v2 = vpop.f32.mrf.mxu0  ;;  %v3018_v7 = vpop.f32.mrf.mxu1 }
 0x1a2   :  { %793 = vmatpush1.msra.mxu1 %v2904_v29  ;;  %2349 = vmatpush3.msra.mxu0 %v2907_v30 }
 0x1a3   :  { %794 = vmatprep.subr.mxu1 %v2910_v31  ;;  %2350 = vmatprep.subr.mxu0 %v2703_v8  ;;  %v3012_v4 = vpop.f32.mrf.mxu0  ;;  %v3022_v10 = vpop.f32.mrf.mxu1 }
 0x1a4   :  { %795 = vmatpush1.msra.mxu1 %v2914_v32  ;;  %2351 = vmatpush3.msra.mxu0 %v2917_v33 }
 0x1a5   :  { %796 = vmatprep.subr.mxu1 %v2920_v34  ;;  %2352 = vmatprep.subr.mxu0 %v2703_v8 }
 0x1a6   :  { %797 = vmatpush1.msra.mxu1 %v2924_v35  ;;  %2353 = vmatpush3.msra.mxu0 %v2927_v36 }
 0x1a7   :  { %798 = vmatprep.subr.mxu1 %v2930_v37  ;;  %2354 = vmatprep.subr.mxu0 %v2703_v8 }
 0x1a8   :  { %799 = vmatpush1.msra.mxu1 %v2934_v38  ;;  %832 = vmatprep.mubr.f32.mxu1 %v2703_v8 }
 0x1a9   :  { %2355 = vmatpush3.msra.mxu0 %v2937_v39  ;;  %2356 = vmatprep.mubr.msk.f32.mxu0 %vm2706_vm12, %v2703_v8 }
 0x1aa   :  { %978 = vmatprep.subr.mxu1 %v2862_v16  ;;  %2359 = vmatprep.subr.mxu0 %v2703_v8 }
 0x1b9   :  { %v3016_v6 = vpop.f32.mrf.mxu0 }
 0x1ba   :  { %v3026_v12 = vpop.f32.mrf.mxu1 }
 0x1bb   :  { %v3020_v9 = vpop.f32.mrf.mxu0 }
 0x1bc   :  { %v3030_v14 = vpop.f32.mrf.mxu1 }
 0x1bd   :  { %v3024_v11 = vpop.f32.mrf.mxu0 }
 0x1bf   :  { %v3028_v13 = vpop.f32.mrf.mxu0 }
 0x259   :  { %v640_v15 = vpop.f32.mrf.mxu1  ;;  %v711_v40 = vpop.f32.mrf.mxu0 }
 0x25a   :  { %v715_v41 = vadd.f32 %v640_v15, %v348_v58  ;;  %v729_v53 = vadd.f32 %v2950_v49, %v711_v40 }
 0x25b   :  { %v2339_v42 = vpop.f32.mrf.mxu0  ;;  %v642_v44 = vpop.f32.mrf.mxu1 }
 0x25c   :  { %v2155_v43 = vmul.f32 -1.442695, %v715_v41  ;;  %v722_v45 = vadd.f32 %v642_v44, %v350_v59 }
 0x25e   :  { %2529 = vpow2.f32 %v2155_v43  ;;  %v2156_v46 = vmul.f32 -1.442695, %v722_v45 }
 0x260   :  { %2531 = vpow2.f32 %v2156_v46 }
 0x26b   :  { %v2530_v47 = vpop.eup %2529 }
 0x26c   :  { %v719_v50 = vadd.f32 1.0, %v2530_v47 }
 0x26d   :  { %v2532_v51 = vpop.eup %2531 }
 0x26e   :  { %2533 = vrcp.f32 %v719_v50  ;;  %v726_v52 = vadd.f32 1.0, %v2532_v51 }
 0x270   :  { %2535 = vrcp.f32 %v726_v52 }
 0x27b   :  { %v2534_v54 = vpop.eup %2533 }
 0x27c   :  { %v730_v55 = vmul.f32 %v2534_v54, %v729_v53 }
 0x27d   :  { %v2536_v58 = vpop.eup %2535 }
 0x27e   :  { %v731_v56 = vadd.f32 %v2945_v48, %v730_v55  ;;  %v733_v15 = vsub.f32 1.0, %v2536_v58  ;;  %v735_v59 = vmul.f32 %v2536_v58, %v2953_v57 }
 0x280   :  { %2537 = vtanh.f32 %v731_v56 }
 0x28d   :  { %v2538_v41 = vpop.eup %2537 }
 0x28e   :  { %v734_v42 = vmul.f32 %v2538_v41, %v733_v15 }
 0x290   :  { %v3035_v43 = vadd.f32 %v735_v59, %v734_v42 }
 0x292   :  { %737 = vst.msk [vmem:[#allocation3 + $0x8] sm:$0xff] %vm251_vm6, %v3035_v43  ;;  %2157 = vmatmul.mubr.msk.f32.vlgmr.msra.gmra.mxu1 %vm251_vm6, %v3035_v43  ;;  %2357 = vmatmul.mubr.msk.f32.vlgmr.msra.gmra.mxu0 %vm251_vm6, %v3035_v43 }
 0x293   :  { %979 = vmatpush1.msra.mxu1 %v2865_v17  ;;  %2360 = vmatpush3.msra.mxu0 %v2867_v18 }
 0x294   :  { %980 = vmatprep.subr.mxu1 %v2870_v19  ;;  %2361 = vmatprep.subr.mxu0 %v2703_v8 }
 0x295   :  { %981 = vmatpush1.msra.mxu1 %v2874_v20  ;;  %2362 = vmatpush3.msra.mxu0 %v2877_v21 }
 0x296   :  { %982 = vmatprep.subr.mxu1 %v2880_v22  ;;  %2363 = vmatprep.subr.mxu0 %v2703_v8 }
 0x297   :  { %983 = vmatpush1.msra.mxu1 %v2884_v23  ;;  %2364 = vmatpush3.msra.mxu0 %v2887_v24 }
 0x298   :  { %984 = vmatprep.subr.mxu1 %v2890_v25  ;;  %2365 = vmatprep.subr.mxu0 %v2703_v8 }
 0x299   :  { %985 = vmatpush1.msra.mxu1 %v2894_v26  ;;  %2366 = vmatpush3.msra.mxu0 %v2897_v27 }
 0x29a   :  { %986 = vmatprep.subr.mxu1 %v2900_v28  ;;  %2367 = vmatprep.subr.mxu0 %v2703_v8 }
 0x29b   :  { %987 = vmatpush1.msra.mxu1 %v2904_v29  ;;  %2368 = vmatpush3.msra.mxu0 %v2907_v30 }
 0x29c   :  { %988 = vmatprep.subr.mxu1 %v2910_v31  ;;  %2369 = vmatprep.subr.mxu0 %v2703_v8 }
 0x29d   :  { %989 = vmatpush1.msra.mxu1 %v2914_v32  ;;  %2370 = vmatpush3.msra.mxu0 %v2917_v33 }
 0x29e   :  { %990 = vmatprep.subr.mxu1 %v2920_v34  ;;  %2371 = vmatprep.subr.mxu0 %v2703_v8 }
 0x29f   :  { %991 = vmatpush1.msra.mxu1 %v2924_v35  ;;  %2372 = vmatpush3.msra.mxu0 %v2927_v36 }
 0x2a0   :  { %992 = vmatprep.subr.mxu1 %v2930_v37  ;;  %2373 = vmatprep.subr.mxu0 %v2703_v8 }
 0x2a1   :  { %993 = vmatpush1.msra.mxu1 %v2934_v38  ;;  %1026 = vmatprep.mubr.f32.mxu1 %v2703_v8 }
 0x2a2   :  { %2374 = vmatpush3.msra.mxu0 %v2937_v39  ;;  %2375 = vmatprep.mubr.msk.f32.mxu0 %vm2706_vm12, %v2703_v8 }
 0x2a3   :  { %1172 = vmatprep.subr.mxu1 %v2862_v16  ;;  %2378 = vmatprep.subr.mxu0 %v2703_v8 }
 0x352   :  { %v834_v48 = vpop.f32.mrf.mxu1  ;;  %v905_v57 = vpop.f32.mrf.mxu0 }
 0x353   :  { %v909_v40 = vadd.f32 %v834_v48, %v2996_v60  ;;  %v923_v55 = vadd.f32 %v2950_v49, %v905_v57 }
 0x354   :  { %v2358_v44 = vpop.f32.mrf.mxu0  ;;  %v836_v46 = vpop.f32.mrf.mxu1 }
 0x355   :  { %v2159_v45 = vmul.f32 -1.442695, %v909_v40  ;;  %v916_v47 = vadd.f32 %v836_v46, %v2998_v61 }
 0x357   :  { %2539 = vpow2.f32 %v2159_v45  ;;  %v2160_v50 = vmul.f32 -1.442695, %v916_v47 }
 0x359   :  { %2541 = vpow2.f32 %v2160_v50 }
 0x364   :  { %v2540_v51 = vpop.eup %2539 }
 0x365   :  { %v913_v52 = vadd.f32 1.0, %v2540_v51 }
 0x366   :  { %v2542_v53 = vpop.eup %2541 }
 0x367   :  { %2543 = vrcp.f32 %v913_v52  ;;  %v920_v54 = vadd.f32 1.0, %v2542_v53 }
 0x369   :  { %2545 = vrcp.f32 %v920_v54 }
 0x374   :  { %v2544_v56 = vpop.eup %2543 }
 0x375   :  { %v924_v58 = vmul.f32 %v2544_v56, %v923_v55 }
 0x376   :  { %v2546_v15 = vpop.eup %2545 }
 0x377   :  { %v925_v60 = vadd.f32 %v924_v58, %v3014_v5  ;;  %v927_v41 = vsub.f32 1.0, %v2546_v15  ;;  %v929_v61 = vmul.f32 %v2546_v15, %v3035_v43 }
 0x379   :  { %2547 = vtanh.f32 %v925_v60 }
 0x386   :  { %v2548_v42 = vpop.eup %2547 }
 0x387   :  { %v928_v59 = vmul.f32 %v2548_v42, %v927_v41 }
 0x389   :  { %v3083_v48 = vadd.f32 %v929_v61, %v928_v59 }
 0x38b   :  { %931 = vst.msk [vmem:[#allocation3 + $0x10] sm:$0xff] %vm251_vm6, %v3083_v48  ;;  %2161 = vmatmul.mubr.msk.f32.vlgmr.msra.gmra.mxu1 %vm251_vm6, %v3083_v48  ;;  %2376 = vmatmul.mubr.msk.f32.vlgmr.msra.gmra.mxu0 %vm251_vm6, %v3083_v48 }
 0x38c   :  { %1173 = vmatpush1.msra.mxu1 %v2865_v17  ;;  %2379 = vmatpush3.msra.mxu0 %v2867_v18 }
 0x38d   :  { %1174 = vmatprep.subr.mxu1 %v2870_v19  ;;  %2380 = vmatprep.subr.mxu0 %v2703_v8 }
 0x38e   :  { %1175 = vmatpush1.msra.mxu1 %v2874_v20  ;;  %2381 = vmatpush3.msra.mxu0 %v2877_v21 }
 0x38f   :  { %1176 = vmatprep.subr.mxu1 %v2880_v22  ;;  %2382 = vmatprep.subr.mxu0 %v2703_v8 }
 0x390   :  { %1177 = vmatpush1.msra.mxu1 %v2884_v23  ;;  %2383 = vmatpush3.msra.mxu0 %v2887_v24 }
 0x391   :  { %1178 = vmatprep.subr.mxu1 %v2890_v25  ;;  %2384 = vmatprep.subr.mxu0 %v2703_v8 }
 0x392   :  { %1179 = vmatpush1.msra.mxu1 %v2894_v26  ;;  %2385 = vmatpush3.msra.mxu0 %v2897_v27 }
 0x393   :  { %1180 = vmatprep.subr.mxu1 %v2900_v28  ;;  %2386 = vmatprep.subr.mxu0 %v2703_v8 }
 0x394   :  { %1181 = vmatpush1.msra.mxu1 %v2904_v29  ;;  %2387 = vmatpush3.msra.mxu0 %v2907_v30 }
 0x395   :  { %1182 = vmatprep.subr.mxu1 %v2910_v31  ;;  %2388 = vmatprep.subr.mxu0 %v2703_v8 }
 0x396   :  { %1183 = vmatpush1.msra.mxu1 %v2914_v32  ;;  %2389 = vmatpush3.msra.mxu0 %v2917_v33 }
 0x397   :  { %1184 = vmatprep.subr.mxu1 %v2920_v34  ;;  %2390 = vmatprep.subr.mxu0 %v2703_v8 }
 0x398   :  { %1185 = vmatpush1.msra.mxu1 %v2924_v35  ;;  %2391 = vmatpush3.msra.mxu0 %v2927_v36 }
 0x399   :  { %1186 = vmatprep.subr.mxu1 %v2930_v37  ;;  %2392 = vmatprep.subr.mxu0 %v2703_v8 }
 0x39a   :  { %1187 = vmatpush1.msra.mxu1 %v2934_v38  ;;  %1220 = vmatprep.mubr.f32.mxu1 %v2703_v8 }
 0x39b   :  { %2393 = vmatpush3.msra.mxu0 %v2937_v39  ;;  %2394 = vmatprep.mubr.msk.f32.mxu0 %vm2706_vm12, %v2703_v8 }
 0x39c   :  { %1366 = vmatprep.subr.mxu1 %v2862_v16  ;;  %2397 = vmatprep.subr.mxu0 %v2703_v8 }
 0x44b   :  { %v1028_v5 = vpop.f32.mrf.mxu1  ;;  %v1099_v43 = vpop.f32.mrf.mxu0 }
 0x44c   :  { %v1103_v57 = vadd.f32 %v1028_v5, %v3000_v62  ;;  %v1117_v54 = vadd.f32 %v2950_v49, %v1099_v43 }
 0x44d   :  { %v2377_v40 = vpop.f32.mrf.mxu0  ;;  %v1030_v45 = vpop.f32.mrf.mxu1 }
 0x44e   :  { %v2163_v44 = vmul.f32 -1.442695, %v1103_v57  ;;  %v1110_v46 = vadd.f32 %v1030_v45, %v3002_v63 }
 0x450   :  { %2549 = vpow2.f32 %v2163_v44  ;;  %v2164_v47 = vmul.f32 -1.442695, %v1110_v46 }
 0x452   :  { %2551 = vpow2.f32 %v2164_v47 }
 0x45d   :  { %v2550_v50 = vpop.eup %2549 }
 0x45e   :  { %v1107_v51 = vadd.f32 1.0, %v2550_v50 }
 0x45f   :  { %v2552_v52 = vpop.eup %2551 }
 0x460   :  { %2553 = vrcp.f32 %v1107_v51  ;;  %v1114_v53 = vadd.f32 1.0, %v2552_v52 }
 0x462   :  { %2555 = vrcp.f32 %v1114_v53 }
 0x46d   :  { %v2554_v55 = vpop.eup %2553 }
 0x46e   :  { %v1118_v56 = vmul.f32 %v2554_v55, %v1117_v54 }
 0x46f   :  { %v2556_v58 = vpop.eup %2555 }
 0x470   :  { %v1119_v62 = vadd.f32 %v3010_v3, %v1118_v56  ;;  %v1121_v60 = vsub.f32 1.0, %v2556_v58  ;;  %v1123_v63 = vmul.f32 %v2556_v58, %v3083_v48 }
 0x472   :  { %2557 = vtanh.f32 %v1119_v62 }
 0x47f   :  { %v2558_v15 = vpop.eup %2557 }
 0x480   :  { %v1122_v41 = vmul.f32 %v2558_v15, %v1121_v60 }
 0x482   :  { %v3131_v42 = vadd.f32 %v1123_v63, %v1122_v41 }
 0x484   :  { %1125 = vst.msk [vmem:[#allocation3 + $0x18] sm:$0xff] %vm251_vm6, %v3131_v42  ;;  %2165 = vmatmul.mubr.msk.f32.vlgmr.msra.gmra.mxu1 %vm251_vm6, %v3131_v42  ;;  %2395 = vmatmul.mubr.msk.f32.vlgmr.msra.gmra.mxu0 %vm251_vm6, %v3131_v42 }
 0x485   :  { %1367 = vmatpush1.msra.mxu1 %v2865_v17  ;;  %2398 = vmatpush3.msra.mxu0 %v2867_v18 }
 0x486   :  { %1368 = vmatprep.subr.mxu1 %v2870_v19  ;;  %2399 = vmatprep.subr.mxu0 %v2703_v8 }
 0x487   :  { %1369 = vmatpush1.msra.mxu1 %v2874_v20  ;;  %2400 = vmatpush3.msra.mxu0 %v2877_v21 }
 0x488   :  { %1370 = vmatprep.subr.mxu1 %v2880_v22  ;;  %2401 = vmatprep.subr.mxu0 %v2703_v8 }
 0x489   :  { %1371 = vmatpush1.msra.mxu1 %v2884_v23  ;;  %2402 = vmatpush3.msra.mxu0 %v2887_v24 }
 0x48a   :  { %1372 = vmatprep.subr.mxu1 %v2890_v25  ;;  %2403 = vmatprep.subr.mxu0 %v2703_v8 }
 0x48b   :  { %1373 = vmatpush1.msra.mxu1 %v2894_v26  ;;  %2404 = vmatpush3.msra.mxu0 %v2897_v27 }
 0x48c   :  { %1374 = vmatprep.subr.mxu1 %v2900_v28  ;;  %2405 = vmatprep.subr.mxu0 %v2703_v8 }
 0x48d   :  { %1375 = vmatpush1.msra.mxu1 %v2904_v29  ;;  %2406 = vmatpush3.msra.mxu0 %v2907_v30 }
 0x48e   :  { %1376 = vmatprep.subr.mxu1 %v2910_v31  ;;  %2407 = vmatprep.subr.mxu0 %v2703_v8 }
 0x48f   :  { %1377 = vmatpush1.msra.mxu1 %v2914_v32  ;;  %2408 = vmatpush3.msra.mxu0 %v2917_v33 }
 0x490   :  { %1378 = vmatprep.subr.mxu1 %v2920_v34  ;;  %2409 = vmatprep.subr.mxu0 %v2703_v8 }
 0x491   :  { %1379 = vmatpush1.msra.mxu1 %v2924_v35  ;;  %2410 = vmatpush3.msra.mxu0 %v2927_v36 }
 0x492   :  { %1380 = vmatprep.subr.mxu1 %v2930_v37  ;;  %2411 = vmatprep.subr.mxu0 %v2703_v8 }
 0x493   :  { %1381 = vmatpush1.msra.mxu1 %v2934_v38  ;;  %1414 = vmatprep.mubr.f32.mxu1 %v2703_v8 }
 0x494   :  { %2412 = vmatpush3.msra.mxu0 %v2937_v39  ;;  %2413 = vmatprep.mubr.msk.f32.mxu0 %vm2706_vm12, %v2703_v8 }
 0x495   :  { %1560 = vmatprep.subr.mxu1 %v2862_v16  ;;  %2416 = vmatprep.subr.mxu0 %v2703_v8 }
 0x544   :  { %v1222_v3 = vpop.f32.mrf.mxu1  ;;  %v1293_v59 = vpop.f32.mrf.mxu0 }
 0x545   :  { %v1297_v61 = vadd.f32 %v1222_v3, %v3004_v0  ;;  %v1311_v50 = vadd.f32 %v2950_v49, %v1293_v59 }
 0x546   :  { %v2396_v48 = vpop.f32.mrf.mxu0  ;;  %v1224_v43 = vpop.f32.mrf.mxu1 }
 0x547   :  { %v2167_v5 = vmul.f32 -1.442695, %v1297_v61  ;;  %v1304_v57 = vadd.f32 %v1224_v43, %v3006_v1 }
 0x549   :  { %2559 = vpow2.f32 %v2167_v5  ;;  %v2168_v40 = vmul.f32 -1.442695, %v1304_v57 }
 0x54b   :  { %2561 = vpow2.f32 %v2168_v40 }
 0x556   :  { %v2560_v44 = vpop.eup %2559 }
 0x557   :  { %v1301_v45 = vadd.f32 1.0, %v2560_v44 }
 0x558   :  { %v2562_v46 = vpop.eup %2561 }
 0x559   :  { %2563 = vrcp.f32 %v1301_v45  ;;  %v1308_v47 = vadd.f32 1.0, %v2562_v46 }
 0x55b   :  { %2565 = vrcp.f32 %v1308_v47 }
 0x566   :  { %v2564_v51 = vpop.eup %2563 }
 0x567   :  { %v1312_v52 = vmul.f32 %v2564_v51, %v1311_v50  ;;  %v1912_v50 = vld [vmem:[%s3338_s3 + $0x10] sm:$0xff]  ;;  %v1911_v51 = vld [vmem:[%s3338_s3 + $0x8] sm:$0xff] }
 0x568   :  { %v2566_v53 = vpop.eup %2565 }
 0x569   :  { %v1313_v0 = vadd.f32 %v1312_v52, %v3022_v10  ;;  %v1315_v54 = vsub.f32 1.0, %v2566_v53  ;;  %v1317_v1 = vmul.f32 %v2566_v53, %v3131_v42  ;;  %v1910_v52 = vld [vmem:[%s3338_s3] sm:$0xff]  ;;  %v1904_v53 = vld [vmem:[#allocation3 + $0x10] sm:$0xff] }
 0x56b   :  { %2567 = vtanh.f32 %v1313_v0  ;;  %v1903_v0 = vld [vmem:[#allocation3 + $0x8] sm:$0xff] }
 0x578   :  { %v2568_v55 = vpop.eup %2567 }
 0x579   :  { %v1316_v56 = vmul.f32 %v2568_v55, %v1315_v54  ;;  %v1905_v54 = vld [vmem:[#allocation3 + $0x18] sm:$0xff] }
 0x57b   :  { %v3179_v62 = vadd.f32 %v1317_v1, %v1316_v56 }
 0x57d   :  { %1319 = vst.msk [vmem:[#allocation3 + $0x20] sm:$0xff] %vm251_vm6, %v3179_v62  ;;  %2169 = vmatmul.mubr.msk.f32.vlgmr.msra.gmra.mxu1 %vm251_vm6, %v3179_v62  ;;  %2414 = vmatmul.mubr.msk.f32.vlgmr.msra.gmra.mxu0 %vm251_vm6, %v3179_v62 }
 0x57e   :  { %1561 = vmatpush1.msra.mxu1 %v2865_v17  ;;  %2417 = vmatpush3.msra.mxu0 %v2867_v18 }
 0x57f   :  { %1562 = vmatprep.subr.mxu1 %v2870_v19  ;;  %2418 = vmatprep.subr.mxu0 %v2703_v8 }
 0x580   :  { %1563 = vmatpush1.msra.mxu1 %v2874_v20  ;;  %2419 = vmatpush3.msra.mxu0 %v2877_v21 }
 0x581   :  { %1564 = vmatprep.subr.mxu1 %v2880_v22  ;;  %2420 = vmatprep.subr.mxu0 %v2703_v8 }
 0x582   :  { %1565 = vmatpush1.msra.mxu1 %v2884_v23  ;;  %2421 = vmatpush3.msra.mxu0 %v2887_v24 }
 0x583   :  { %1566 = vmatprep.subr.mxu1 %v2890_v25  ;;  %2422 = vmatprep.subr.mxu0 %v2703_v8 }
 0x584   :  { %1567 = vmatpush1.msra.mxu1 %v2894_v26  ;;  %2423 = vmatpush3.msra.mxu0 %v2897_v27  ;;  %v1906_v55 = vld [vmem:[#allocation3 + $0x20] sm:$0xff] }
 0x585   :  { %1568 = vmatprep.subr.mxu1 %v2900_v28  ;;  %2424 = vmatprep.subr.mxu0 %v2703_v8 }
 0x586   :  { %1569 = vmatpush1.msra.mxu1 %v2904_v29  ;;  %2425 = vmatpush3.msra.mxu0 %v2907_v30 }
 0x587   :  { %1570 = vmatprep.subr.mxu1 %v2910_v31  ;;  %2426 = vmatprep.subr.mxu0 %v2703_v8 }
 0x588   :  { %1571 = vmatpush1.msra.mxu1 %v2914_v32  ;;  %2427 = vmatpush3.msra.mxu0 %v2917_v33 }
 0x589   :  { %1572 = vmatprep.subr.mxu1 %v2920_v34  ;;  %2428 = vmatprep.subr.mxu0 %v2703_v8 }
 0x58a   :  { %1573 = vmatpush1.msra.mxu1 %v2924_v35  ;;  %2429 = vmatpush3.msra.mxu0 %v2927_v36 }
 0x58b   :  { %1574 = vmatprep.subr.mxu1 %v2930_v37  ;;  %2430 = vmatprep.subr.mxu0 %v2703_v8 }
 0x58c   :  { %1575 = vmatpush1.msra.mxu1 %v2934_v38  ;;  %1608 = vmatprep.mubr.f32.mxu1 %v2703_v8 }
 0x58d   :  { %2431 = vmatpush3.msra.mxu0 %v2937_v39  ;;  %2432 = vmatprep.mubr.msk.f32.mxu0 %vm2706_vm12, %v2703_v8 }
 0x58e   :  { %1754 = vmatprep.subr.mxu1 %v2862_v16  ;;  %2435 = vmatprep.subr.mxu0 %v2703_v8 }
 0x63d   :  { %v1416_v10 = vpop.f32.mrf.mxu1  ;;  %v1487_v58 = vpop.f32.mrf.mxu0 }
 0x63e   :  { %v1491_v60 = vadd.f32 %v1416_v10, %v3008_v2  ;;  %v1505_v16 = vadd.f32 %v2950_v49, %v1487_v58 }
 0x63f   :  { %v2415_v15 = vpop.f32.mrf.mxu0  ;;  %v1418_v63 = vpop.f32.mrf.mxu1 }
 0x640   :  { %v2171_v41 = vmul.f32 -1.442695, %v1491_v60  ;;  %v1498_v42 = vadd.f32 %v1418_v63, %v3012_v4 }
 0x642   :  { %2569 = vpow2.f32 %v2171_v41  ;;  %v2172_v3 = vmul.f32 -1.442695, %v1498_v42 }
 0x644   :  { %2571 = vpow2.f32 %v2172_v3  ;;  %v3317_v3 = vld [vmem:[%s3339_s4 + $0x1] ss:$0 sm:$0xff]  ;;  %s2707_s4 = smov [#allocation9]  }
 0x645   :  { %s2113_s10 = sshll.u32 %s2707_s4, 4  ;;  %s2114_s10 = int_to_ptr.vmem [resolvable:$true] %s2113_s10 }
 0x646   :  { %s2671_s11 = scalar_lea.vmem %s2114_s10, 1024  ;;  %p2676_p11 = scmp.lt.s32.totalorder %s2114_s10, %s2114_s10 }
 0x647   :  { %p2672_p10 = scmp.ne.s32.totalorder %s2114_s10, %s2671_s11  ;;  %p2677_p12 = scmp.lt.s32.totalorder %s2671_s11, %s2671_s11 }
 0x649   :  { %p2678_p13 = por %p2677_p12, %p2676_p11 }
 0x64b   :  { %p2679_p0 = pnand %p2678_p13, %p2672_p10 }
 0x64f   :  { %v2570_v59 = vpop.eup %2569 }
 0x650   :  { %v1495_v61 = vadd.f32 1.0, %v2570_v59 }
 0x651   :  { %v2572_v48 = vpop.eup %2571 }
 0x652   :  { %2573 = vrcp.f32 %v1495_v61  ;;  %v1502_v5 = vadd.f32 1.0, %v2572_v48 }
 0x654   :  { %2575 = vrcp.f32 %v1502_v5 }
 0x65f   :  { %v2574_v43 = vpop.eup %2573 }
 0x660   :  { %v1506_v57 = vmul.f32 %v2574_v43, %v1505_v16 }
 0x661   :  { %v2576_v40 = vpop.eup %2575 }
 0x662   :  { %v1507_v2 = vadd.f32 %v3018_v7, %v1506_v57  ;;  %v1509_v44 = vsub.f32 1.0, %v2576_v40  ;;  %v1511_v4 = vmul.f32 %v2576_v40, %v3179_v62  ;;  %v1915_v7 = vld [vmem:[%s3338_s3 + $0x28] sm:$0xff] }
 0x664   :  { %2577 = vtanh.f32 %v1507_v2 }
 0x671   :  { %v2578_v45 = vpop.eup %2577 }
 0x672   :  { %v1510_v46 = vmul.f32 %v2578_v45, %v1509_v44 }
 0x674   :  { %v3227_v47 = vadd.f32 %v1511_v4, %v1510_v46 }
 0x676   :  { %1513 = vst.msk [vmem:[#allocation3 + $0x28] sm:$0xff] %vm251_vm6, %v3227_v47  ;;  %2173 = vmatmul.mubr.msk.f32.vlgmr.msra.gmra.mxu1 %vm251_vm6, %v3227_v47  ;;  %2433 = vmatmul.mubr.msk.f32.vlgmr.msra.gmra.mxu0 %vm251_vm6, %v3227_v47 }
 0x677   :  { %1755 = vmatpush1.msra.mxu1 %v2865_v17  ;;  %2436 = vmatpush3.msra.mxu0 %v2867_v18  ;;  %v1917_v17 = vld [vmem:[%s3338_s3 + $0x38] sm:$0xff] }
 0x678   :  { %1756 = vmatprep.subr.mxu1 %v2870_v19  ;;  %2437 = vmatprep.subr.mxu0 %v2703_v8 }
 0x679   :  { %1757 = vmatpush1.msra.mxu1 %v2874_v20  ;;  %2438 = vmatpush3.msra.mxu0 %v2877_v21 }
 0x67a   :  { %1758 = vmatprep.subr.mxu1 %v2880_v22  ;;  %2439 = vmatprep.subr.mxu0 %v2703_v8 }
 0x67b   :  { %1759 = vmatpush1.msra.mxu1 %v2884_v23  ;;  %2440 = vmatpush3.msra.mxu0 %v2887_v24 }
 0x67c   :  { %1760 = vmatprep.subr.mxu1 %v2890_v25  ;;  %2441 = vmatprep.subr.mxu0 %v2703_v8 }
 0x67d   :  { %1761 = vmatpush1.msra.mxu1 %v2894_v26  ;;  %2442 = vmatpush3.msra.mxu0 %v2897_v27  ;;  %v1907_v56 = vld [vmem:[#allocation3 + $0x28] sm:$0xff] }
 0x67e   :  { %1762 = vmatprep.subr.mxu1 %v2900_v28  ;;  %2443 = vmatprep.subr.mxu0 %v2703_v8 }
 0x67f   :  { %1763 = vmatpush1.msra.mxu1 %v2904_v29  ;;  %2444 = vmatpush3.msra.mxu0 %v2907_v30 }
 0x680   :  { %1764 = vmatprep.subr.mxu1 %v2910_v31  ;;  %2445 = vmatprep.subr.mxu0 %v2703_v8 }
 0x681   :  { %1765 = vmatpush1.msra.mxu1 %v2914_v32  ;;  %2446 = vmatpush3.msra.mxu0 %v2917_v33 }
 0x682   :  { %1766 = vmatprep.subr.mxu1 %v2920_v34  ;;  %2447 = vmatprep.subr.mxu0 %v2703_v8 }
 0x683   :  { %1767 = vmatpush1.msra.mxu1 %v2924_v35  ;;  %2448 = vmatpush3.msra.mxu0 %v2927_v36 }
 0x684   :  { %1768 = vmatprep.subr.mxu1 %v2930_v37  ;;  %2449 = vmatprep.subr.mxu0 %v2703_v8 }
 0x685   :  { %1769 = vmatpush1.msra.mxu1 %v2934_v38  ;;  %1802 = vmatprep.mubr.f32.mxu1 %v2703_v8 }
 0x686   :  { %2450 = vmatpush3.msra.mxu0 %v2937_v39  ;;  %2451 = vmatprep.mubr.msk.f32.mxu0 %vm2706_vm12, %v2703_v8  ;;  %v1916_v39 = vld [vmem:[%s3338_s3 + $0x30] sm:$0xff] }
 0x687   :  { %2454 = vmatprep.subr.mxu1 %v1917_v17 }
 0x736   :  { %v1610_v18 = vpop.f32.mrf.mxu1  ;;  %v1681_v19 = vpop.f32.mrf.mxu0 }
 0x737   :  { %v1685_v20 = vadd.f32 %v1610_v18, %v3016_v6  ;;  %v1699_v29 = vadd.f32 %v2950_v49, %v1681_v19  ;;  %v1902_v6 = vld [vmem:[#allocation3] sm:$0xff] }
 0x738   :  { %v2434_v21 = vpop.f32.mrf.mxu0  ;;  %v1612_v23 = vpop.f32.mrf.mxu1 }
 0x739   :  { %v2175_v22 = vmul.f32 -1.442695, %v1685_v20  ;;  %v1692_v24 = vadd.f32 %v1612_v23, %v3020_v9  ;;  %v1914_v9 = vld [vmem:[%s3338_s3 + $0x20] sm:$0xff] }
 0x73b   :  { %2579 = vpow2.f32 %v2175_v22  ;;  %v2176_v25 = vmul.f32 -1.442695, %v1692_v24 }
 0x73d   :  { %2581 = vpow2.f32 %v2176_v25 }
 0x748   :  { %v2580_v26 = vpop.eup %2579 }
 0x749   :  { %v1689_v27 = vadd.f32 1.0, %v2580_v26 }
 0x74a   :  { %v2582_v8 = vpop.eup %2581 }
 0x74b   :  { %2583 = vrcp.f32 %v1689_v27  ;;  %v1696_v28 = vadd.f32 1.0, %v2582_v8 }
 0x74d   :  { %2585 = vrcp.f32 %v1696_v28 }
 0x758   :  { %v2584_v30 = vpop.eup %2583 }
 0x759   :  { %v1700_v31 = vmul.f32 %v2584_v30, %v1699_v29 }
 0x75a   :  { %v2586_v33 = vpop.eup %2585 }
 0x75b   :  { %v1701_v32 = vadd.f32 %v1700_v31, %v3030_v14  ;;  %v1703_v34 = vsub.f32 1.0, %v2586_v33  ;;  %v1705_v37 = vmul.f32 %v2586_v33, %v3227_v47  ;;  %v1913_v14 = vld [vmem:[%s3338_s3 + $0x18] sm:$0xff] }
 0x75d   :  { %2587 = vtanh.f32 %v1701_v32 }
 0x76a   :  { %v2588_v35 = vpop.eup %2587 }
 0x76b   :  { %v1704_v36 = vmul.f32 %v2588_v35, %v1703_v34 }
 0x76d   :  { %v3276_v38 = vadd.f32 %v1705_v37, %v1704_v36 }
 0x76f   :  { %1707 = vst.msk [vmem:[#allocation3 + $0x30] sm:$0xff] %vm251_vm6, %v3276_v38  ;;  %2177 = vmatmul.mubr.msk.f32.vlgmr.msra.gmra.mxu1 %vm251_vm6, %v3276_v38  ;;  %2452 = vmatmul.mubr.msk.f32.vlgmr.msra.gmra.mxu0 %vm251_vm6, %v3276_v38 }
 0x770   :  { %2455 = vmatpush3.msra.mxu1 %v1917_v17  ;;  %2470 = vmatprep.mubr.msk.f32.mxu1 %vm251_vm6, %v1902_v6 }
 0x771   :  { %2456 = vmatprep.subr.mxu1 %v1916_v39 }
 0x772   :  { %2457 = vmatpush3.msra.mxu1 %v1916_v39 }
 0x773   :  { %2458 = vmatprep.subr.mxu1 %v1915_v7 }
 0x774   :  { %2459 = vmatpush3.msra.mxu1 %v1915_v7 }
 0x775   :  { %2460 = vmatprep.subr.mxu1 %v1914_v9 }
 0x776   :  { %2461 = vmatpush3.msra.mxu1 %v1914_v9  ;;  %v1908_v1 = vld [vmem:[#allocation3 + $0x30] sm:$0xff] }
 0x777   :  { %2462 = vmatprep.subr.mxu1 %v1913_v14 }
 0x778   :  { %2463 = vmatpush3.msra.mxu1 %v1913_v14 }
 0x779   :  { %2464 = vmatprep.subr.mxu1 %v1912_v50 }
 0x77a   :  { %2465 = vmatpush3.msra.mxu1 %v1912_v50 }
 0x77b   :  { %2466 = vmatprep.subr.mxu1 %v1911_v51 }
 0x77c   :  { %2467 = vmatpush3.msra.mxu1 %v1911_v51 }
 0x77d   :  { %2468 = vmatprep.subr.mxu1 %v1910_v52 }
 0x77e   :  { %2469 = vmatpush3.msra.mxu1 %v1910_v52 }
 0x77f   :  { %2471 = vmatmul.mubr.msk.f32.vlgmr.msra.gmra.mxu1 %vm251_vm6, %v1903_v0 }
 0x780   :  { %2473 = vmatprep.mubr.msk.f32.mxu1 %vm251_vm6, %v1904_v53 }
 0x783   :  { %2474 = vmatmul.mubr.msk.f32.gmra.mxu1 %vm251_vm6, %v1905_v54 }
 0x784   :  { %2476 = vmatprep.mubr.msk.f32.mxu1 %vm251_vm6, %v1906_v55 }
 0x787   :  { %2477 = vmatmul.mubr.msk.f32.gmra.mxu1 %vm251_vm6, %v1907_v56 }
 0x788   :  { %2479 = vmatprep.mubr.msk.f32.mxu1 %vm251_vm6, %v1908_v1 }
 0x82f   :  { %v1804_v62 = vpop.f32.mrf.mxu1  ;;  %v1875_v10 = vpop.f32.mrf.mxu0 }
 0x830   :  { %v1879_v58 = vadd.f32 %v1804_v62, %v3024_v11  ;;  %v1893_v23 = vadd.f32 %v2950_v49, %v1875_v10 }
 0x831   :  { %v2453_v60 = vpop.f32.mrf.mxu0  ;;  %v1806_v41 = vpop.f32.mrf.mxu1 }
 0x832   :  { %v2179_v15 = vmul.f32 -1.442695, %v1879_v58  ;;  %v1886_v63 = vadd.f32 %v1806_v41, %v3028_v13 }
 0x834   :  { %2589 = vpow2.f32 %v2179_v15  ;;  %v2180_v42 = vmul.f32 -1.442695, %v1886_v63 }
 0x836   :  { %2591 = vpow2.f32 %v2180_v42 }
 0x83f   :  { %v2472_v59 = vpop.f32.mrf.mxu1 }
 0x840   :  { %v2019_v61 = vadd.f32 %v2472_v59, %v3317_v3 }
 0x841   :  { %v2590_v48 = vpop.eup %2589  ;;  %v2013_v5 = vpop.f32.mrf.mxu1 }
 0x842   :  { %v1883_v16 = vadd.f32 1.0, %v2590_v48  ;;  %v2191_v11 = vmul.f32 -1.442695, %v2019_v61  ;;  %v2014_v43 = vadd.f32 %v3317_v3, %v2013_v5 }
 0x843   :  { %v2475_v57 = vpop.f32.mrf.mxu1  ;;  %v2592_v20 = vpop.eup %2591 }
 0x844   :  { %2593 = vrcp.f32 %v1883_v16  ;;  %v2190_v2 = vmul.f32 -1.442695, %v2014_v43  ;;  %v2029_v13 = vadd.f32 %v2475_v57, %v3317_v3  ;;  %v1890_v22 = vadd.f32 1.0, %v2592_v20 }
 0x845   :  { %2595 = vpow2.f32 %v2191_v11  ;;  %v2023_v40 = vpop.f32.mrf.mxu1 }
 0x846   :  { %v2193_v44 = vmul.f32 -1.442695, %v2029_v13  ;;  %v2024_v45 = vadd.f32 %v3317_v3, %v2023_v40  ;;  %2597 = vpow2.f32 %v2190_v2 }
 0x847   :  { %v2478_v46 = vpop.f32.mrf.mxu1 }
 0x848   :  { %2599 = vpow2.f32 %v2193_v44  ;;  %v2192_v4 = vmul.f32 -1.442695, %v2024_v45  ;;  %v2039_v47 = vadd.f32 %v2478_v46, %v3317_v3 }
 0x849   :  { %v2033_v17 = vpop.f32.mrf.mxu1 }
 0x84a   :  { %2601 = vpow2.f32 %v2192_v4  ;;  %v2195_v18 = vmul.f32 -1.442695, %v2039_v47  ;;  %v2034_v19 = vadd.f32 %v3317_v3, %v2033_v17 }
 0x84c   :  { %2603 = vpow2.f32 %v2195_v18  ;;  %v2194_v21 = vmul.f32 -1.442695, %v2034_v19 }
 0x84e   :  { %2605 = vpow2.f32 %v2194_v21 }
 0x84f   :  { %2607 = vrcp.f32 %v1890_v22 }
 0x851   :  { %v2594_v24 = vpop.eup %2593 }
 0x852   :  { %v2596_v25 = vpop.eup %2595  ;;  %v1894_v26 = vmul.f32 %v2594_v24, %v1893_v23 }
 0x853   :  { %v2077_v27 = vadd.f32 1.0, %v2596_v25  ;;  %v2598_v8 = vpop.eup %2597 }
 0x854   :  { %v1895_v28 = vadd.f32 %v3026_v12, %v1894_v26  ;;  %v2076_v30 = vadd.f32 1.0, %v2598_v8 }
 0x855   :  { %v2600_v29 = vpop.eup %2599  ;;  %2609 = vrcp.f32 %v2077_v27 }
 0x856   :  { %2611 = vtanh.f32 %v1895_v28  ;;  %v2079_v31 = vadd.f32 1.0, %v2600_v29 }
 0x857   :  { %v2602_v32 = vpop.eup %2601  ;;  %2613 = vrcp.f32 %v2076_v30 }
 0x858   :  { %2615 = vrcp.f32 %v2079_v31  ;;  %v2078_v33 = vadd.f32 1.0, %v2602_v32 }
 0x859   :  { %v2604_v34 = vpop.eup %2603 }
 0x85a   :  { %2617 = vrcp.f32 %v2078_v33  ;;  %v2081_v49 = vadd.f32 1.0, %v2604_v34 }
 0x85b   :  { %v2606_v35 = vpop.eup %2605 }
 0x85c   :  { %2619 = vrcp.f32 %v2081_v49  ;;  %v2080_v36 = vadd.f32 1.0, %v2606_v35  ;;  %v2608_v37 = vpop.eup %2607 }
 0x85d   :  { %v1897_v6 = vsub.f32 1.0, %v2608_v37  ;;  %v1899_v14 = vmul.f32 %v2608_v37, %v3276_v38 }
 0x85e   :  { %2621 = vrcp.f32 %v2080_v36 }
 0x862   :  { %v2610_v39 = vpop.eup %2609 }
 0x863   :  { %v2612_v12 = vpop.eup %2611  ;;  %2101 = vst [vmem:[#allocation9 + $0x8] sm:$0xff] %v2610_v39 }
 0x864   :  { %v2614_v7 = vpop.eup %2613  ;;  %v1898_v9 = vmul.f32 %v2612_v12, %v1897_v6 }
 0x865   :  { %v2616_v50 = vpop.eup %2615  ;;  %2100 = vst [vmem:[#allocation9] sm:$0xff] %v2614_v7 }
 0x866   :  { %v1900_v51 = vadd.f32 %v1899_v14, %v1898_v9  ;;  %2103 = vst [vmem:[#allocation9 + $0x18] sm:$0xff] %v2616_v50 }
 0x867   :  { %v2618_v52 = vpop.eup %2617 }
 0x868   :  { %1901 = vst.msk [vmem:[#allocation3 + $0x38] sm:$0xff] %vm251_vm6, %v1900_v51  ;;  %2102 = vst [vmem:[#allocation9 + $0x10] sm:$0xff] %v2618_v52 }
 0x869   :  { %v2620_v0 = vpop.eup %2619 }
 0x86a   :  { %2105 = vst [vmem:[#allocation9 + $0x28] sm:$0xff] %v2620_v0 }
 0x86b   :  { %v2622_v53 = vpop.eup %2621 }
 0x86c   :  { %2104 = vst [vmem:[#allocation9 + $0x20] sm:$0xff] %v2622_v53 }
 0x86f   :  { %v1909_v54 = vld [vmem:[#allocation3 + $0x38] sm:$0xff] }
 0x870   :  { %2480 = vmatmul.mubr.msk.f32.gmra.mxu1 %vm251_vm6, %v1909_v54 }
 0x930   :  { %v2481_v55 = vpop.f32.mrf.mxu1 }
 0x931   :  { %v2049_v56 = vadd.f32 %v2481_v55, %v3317_v3 }
 0x932   :  { %v2043_v1 = vpop.f32.mrf.mxu1 }
 0x933   :  { %v2197_v38 = vmul.f32 -1.442695, %v2049_v56  ;;  %v2044_v62 = vadd.f32 %v3317_v3, %v2043_v1 }
 0x935   :  { %2623 = vpow2.f32 %v2197_v38  ;;  %v2196_v10 = vmul.f32 -1.442695, %v2044_v62 }
 0x937   :  { %2625 = vpow2.f32 %v2196_v10 }
 0x942   :  { %v2624_v58 = vpop.eup %2623 }
 0x943   :  { %v2083_v60 = vadd.f32 1.0, %v2624_v58 }
 0x944   :  { %v2626_v15 = vpop.eup %2625 }
 0x945   :  { %2627 = vrcp.f32 %v2083_v60  ;;  %v2082_v41 = vadd.f32 1.0, %v2626_v15 }
 0x947   :  { %2629 = vrcp.f32 %v2082_v41 }
 0x952   :  { %v2628_v63 = vpop.eup %2627 }
 0x953   :  { %2107 = vst [vmem:[#allocation9 + $0x38] sm:$0xff] %v2628_v63 }
 0x954   :  { %v2630_v42 = vpop.eup %2629 }
 0x955   :  { %2106 = vst [vmem:[#allocation9 + $0x30] sm:$0xff] %v2630_v42 }
 0x956   :  { %2682 = shalt.err (!%p2679_p0)
}
 0x957   :  { %s2708_s12 = smov 128   ;;  %s2709_s13 = smov 8  }
 0x958   :  { %2119 = dma.vmem_to_hbm [thread:$0]  %s2114_s10, 1024, %s3340_s5, [#allocation6], %s2708_s12, %s2708_s12, %s2709_s13  }
 0x959   :  { %2695 = dma.done.wait [#allocation6], 1024  }
 0x95a   :  { %2696 = vsyncadd [#allocation6], 4294966272 }
 0x95b   :  { %2123 = vsyncpa [#allocation5], 1 }
 0x95c   :  { %2124 = vsyncpa [#allocation8], 1 }
 0x95d   :  { %2125 = vsyncpa [#allocation6], 1 }

</bundles_post_ra>
